<compile_context>
chip_gen: v7x
topology: tpu7x:2x2x1
jax: 0.10.0
libtpu: 0.0.40
codegen_flags: <defaults>
</compile_context>

<pallas_src>
import numpy as np

import jax
import jax.numpy as jnp
from jax import lax
from jax.experimental import pallas as pl
from jax.experimental.pallas import tpu as pltpu  # noqa: F401  (TPU backend)


# ----------------------------------------------------------------------------
# Static architecture of the representative encoder net
# ----------------------------------------------------------------------------
NB = 2              # batch
C_IN = 4            # input channels
H_IN = W_IN = 16    # input spatial
C1 = 8              # conv1 out channels
H1 = W1 = 8         # conv1 out spatial (k=3, stride=2, pad=1)
C2 = 16             # conv2 out channels
H2 = W2 = 4         # conv2 out spatial
D_OUT = 32          # linear out features
KH = KW = 3         # conv kernel

K1 = C_IN * H_IN * W_IN     # 1024  (flattened input per image)
N1 = C1 * H1 * W1           # 512   (flattened conv1 output per image)
N2 = C2 * H2 * W2           # 256   (flattened conv2 output per image = Flatten)


# ----------------------------------------------------------------------------
# Fused kernel: conv1+ReLU -> conv2+ReLU -> Flatten -> Linear  ==  3 GEMMs
# ----------------------------------------------------------------------------
def _encoder_fused_kernel(x_ref, a1_ref, a2_ref, wl_ref,
                          b1_ref, b2_ref, bl_ref, o_ref):
    """All refs are full arrays in VMEM (gridless call).

    x_ref : [nb, 1024]   NCHW-flattened input (batch on sublanes)
    a1_ref: [1024, 512]  conv1 expressed as a dense GEMM matrix
    a2_ref: [512, 256]   conv2 expressed as a dense GEMM matrix
    wl_ref: [256, 32]    Linear weight, already transposed
    b1_ref: [1, 512]     conv1 bias broadcast over spatial positions
    b2_ref: [1, 256]     conv2 bias broadcast over spatial positions
    bl_ref: [1, 32]      Linear bias
    o_ref : [nb, 32]     output (lane-dense, no transpose needed outside)
    """
    f32 = jnp.float32
    x = x_ref[...]                                                   # [nb,1024]
    h1 = jnp.maximum(
        jnp.dot(x, a1_ref[...], preferred_element_type=f32) + b1_ref[...], 0.0)
    h2 = jnp.maximum(
        jnp.dot(h1, a2_ref[...], preferred_element_type=f32) + b2_ref[...], 0.0)
    o_ref[...] = (jnp.dot(h2, wl_ref[...], preferred_element_type=f32)
                  + bl_ref[...])


# ----------------------------------------------------------------------------
# One-time packing (outside the jitted hot path): fold conv weights into the
# stride-2/zero-pad spatial selection pattern -> one dense GEMM per layer.
# ----------------------------------------------------------------------------
def _selection_matrices(h_in, w_in, h_out, w_out):
    """g[t, q, p] = 1 iff input pixel q feeds output pixel p under tap t."""
    g = np.zeros((KH * KW, h_in * w_in, h_out * w_out), np.float32)
    for ki in range(KH):
        for kj in range(KW):
            t = ki * KW + kj
            for oh in range(h_out):
                for ow in range(w_out):
                    h, w = 2 * oh + ki - 1, 2 * ow + kj - 1
                    if 0 <= h < h_in and 0 <= w < w_in:
                        g[t, h * w_in + w, oh * w_out + ow] = 1.0
    return g


def pack_params(params):
    """Pre-pack weights/biases into the 3-GEMM layout (called ONCE)."""
    g1 = _selection_matrices(H_IN, W_IN, H1, W1)          # [9, 256, 64]
    g2 = _selection_matrices(H1, W1, H2, W2)              # [9,  64, 16]
    w1 = np.asarray(params["w1"], np.float32).reshape(C1, C_IN, KH * KW)
    w2 = np.asarray(params["w2"], np.float32).reshape(C2, C1, KH * KW)
    # A[(c, q), (o, p)] = sum_t w[o, c, t] * g[t, q, p].  For each (q, p) at
    # most one tap hits, so this is an exact scatter of the f32 conv weights.
    a1 = np.einsum("oct,tqp->cqop", w1, g1).reshape(K1, N1)   # [1024, 512]
    a2 = np.einsum("oct,tqp->cqop", w2, g2).reshape(N1, N2)   # [ 512, 256]
    return {
        "a1": jnp.asarray(a1),
        "a2": jnp.asarray(a2),
        "wl": jnp.asarray(params["w_lin"]).T,                 # [256, 32]
        "b1": jnp.repeat(params["b1"], H1 * W1).reshape(1, N1),
        "b2": jnp.repeat(params["b2"], H2 * W2).reshape(1, N2),
        "bl": params["b_lin"].reshape(1, D_OUT),
    }


# ----------------------------------------------------------------------------
# The Encoder forward (wraps the "net") -- one fused pallas_call
# ----------------------------------------------------------------------------
def encoder_forward(x, packed):
    """Encoder.forward(x) == net(x).  x: [N, C, H, W] (NCHW)."""
    nb = x.shape[0]
    x2d = x.reshape(nb, -1)               # free flatten of contiguous NCHW

    inputs = (x2d, packed["a1"], packed["a2"], packed["wl"],
              packed["b1"], packed["b2"], packed["bl"])

    flops = 2 * nb * (K1 * N1 + N1 * N2 + N2 * D_OUT)
    bytes_accessed = int(sum(a.size * a.dtype.itemsize for a in inputs)
                         + nb * D_OUT * 4)

    return pl.pallas_call(
        _encoder_fused_kernel,
        out_shape=jax.ShapeDtypeStruct((nb, D_OUT), jnp.float32),
        cost_estimate=pl.CostEstimate(flops=flops, transcendentals=0,
                                      bytes_accessed=bytes_accessed),
    )(*inputs)


# ----------------------------------------------------------------------------
# Pure-JAX reference (mirrors the PyTorch net exactly)
# ----------------------------------------------------------------------------
def encoder_reference(x, params):
    def conv(x, w, b):
        y = lax.conv_general_dilated(
            x, w, window_strides=(2, 2), padding=((1, 1), (1, 1)),
            dimension_numbers=("NCHW", "OIHW", "NCHW"))
        return y + b.reshape(1, -1, 1, 1)

    h = jax.nn.relu(conv(x, params["w1"], params["b1"]))
    h = jax.nn.relu(conv(h, params["w2"], params["b2"]))
    flat = h.reshape(h.shape[0], -1)
    return flat @ params["w_lin"].T + params["b_lin"]


# ----------------------------------------------------------------------------
# Deterministic parameter init + run
# ----------------------------------------------------------------------------
def make_params(key):
    k1, k2, k3, k4, k5, k6 = jax.random.split(key, 6)
    return {
        "w1": 0.1 * jax.random.normal(k1, (C1, C_IN, KH, KW), jnp.float32),
        "b1": 0.1 * jax.random.normal(k2, (C1,), jnp.float32),
        "w2": 0.1 * jax.random.normal(k3, (C2, C1, KH, KW), jnp.float32),
        "b2": 0.1 * jax.random.normal(k4, (C2,), jnp.float32),
        "w_lin": 0.05 * jax.random.normal(k5, (D_OUT, C2 * H2 * W2), jnp.float32),
        "b_lin": 0.05 * jax.random.normal(k6, (D_OUT,), jnp.float32),
    }


if __name__ == "__main__":
    key = jax.random.PRNGKey(0)
    kx, kp = jax.random.split(key)
    x = jax.random.normal(kx, (NB, C_IN, H_IN, W_IN), jnp.float32)   # NCHW
    params = make_params(kp)

    packed = pack_params(params)        # one-time weight packing (hoisted)
    fwd = jax.jit(encoder_forward)

    out = jax.block_until_ready(fwd(x, packed))
    ref = jax.block_until_ready(encoder_reference(x, params))

    np.testing.assert_allclose(np.asarray(out), np.asarray(ref),
                               rtol=1e-4, atol=1e-4)
    assert out.shape == (NB, D_OUT)
    print("KERNEL_OK")
</pallas_src>

<mosaic_0001>
module attributes {stable_mosaic.version = 11 : i64} {
  func.func @_encoder_fused_kernel(%arg0: memref<2x1024xf32, #tpu.memory_space<vmem>>, %arg1: memref<1024x512xf32, #tpu.memory_space<vmem>>, %arg2: memref<512x256xf32, #tpu.memory_space<vmem>>, %arg3: memref<256x32xf32, #tpu.memory_space<vmem>>, %arg4: memref<1x512xf32, #tpu.memory_space<vmem>>, %arg5: memref<1x256xf32, #tpu.memory_space<vmem>>, %arg6: memref<1x32xf32, #tpu.memory_space<vmem>>, %arg7: memref<2x32xf32, #tpu.memory_space<vmem>>) attributes {dimension_semantics = [], scalar_prefetch = 0 : i64, scratch_operands = 0 : i64, tpu.core_type = #tpu.core_type<tc>} {
    %c0 = arith.constant 0 : index
    %c0_0 = arith.constant 0 : index
    %0 = vector.load %arg0[%c0, %c0_0] : memref<2x1024xf32, #tpu.memory_space<vmem>>, vector<2x1024xf32>
    %c0_1 = arith.constant 0 : index
    %c0_2 = arith.constant 0 : index
    %1 = vector.load %arg1[%c0_1, %c0_2] : memref<1024x512xf32, #tpu.memory_space<vmem>>, vector<1024x512xf32>
    %cst = arith.constant dense<0.000000e+00> : vector<2x512xf32>
    %2 = tpu.matmul %0, %1, %cst {dimension_numbers = #tpu.dot_dimension_numbers<[1], [0], [0], [1], [0, 0, 1, 1], [], []>} : vector<2x1024xf32>, vector<1024x512xf32>, vector<2x512xf32> -> vector<2x512xf32>
    %c0_3 = arith.constant 0 : index
    %c0_4 = arith.constant 0 : index
    %3 = vector.load %arg4[%c0_3, %c0_4] : memref<1x512xf32, #tpu.memory_space<vmem>>, vector<1x512xf32>
    %4 = vector.broadcast %3 : vector<1x512xf32> to vector<2x512xf32>
    %5 = arith.addf %2, %4 : vector<2x512xf32>
    %cst_5 = arith.constant 0.000000e+00 : f32
    %6 = vector.broadcast %cst_5 : f32 to vector<2x512xf32>
    %7 = arith.maximumf %5, %6 : vector<2x512xf32>
    %c0_6 = arith.constant 0 : index
    %c0_7 = arith.constant 0 : index
    %8 = vector.load %arg2[%c0_6, %c0_7] : memref<512x256xf32, #tpu.memory_space<vmem>>, vector<512x256xf32>
    %cst_8 = arith.constant dense<0.000000e+00> : vector<2x256xf32>
    %9 = tpu.matmul %7, %8, %cst_8 {dimension_numbers = #tpu.dot_dimension_numbers<[1], [0], [0], [1], [0, 0, 1, 1], [], []>} : vector<2x512xf32>, vector<512x256xf32>, vector<2x256xf32> -> vector<2x256xf32>
    %c0_9 = arith.constant 0 : index
    %c0_10 = arith.constant 0 : index
    %10 = vector.load %arg5[%c0_9, %c0_10] : memref<1x256xf32, #tpu.memory_space<vmem>>, vector<1x256xf32>
    %11 = vector.broadcast %10 : vector<1x256xf32> to vector<2x256xf32>
    %12 = arith.addf %9, %11 : vector<2x256xf32>
    %cst_11 = arith.constant 0.000000e+00 : f32
    %13 = vector.broadcast %cst_11 : f32 to vector<2x256xf32>
    %14 = arith.maximumf %12, %13 : vector<2x256xf32>
    %c0_12 = arith.constant 0 : index
    %c0_13 = arith.constant 0 : index
    %15 = vector.load %arg3[%c0_12, %c0_13] : memref<256x32xf32, #tpu.memory_space<vmem>>, vector<256x32xf32>
    %cst_14 = arith.constant dense<0.000000e+00> : vector<2x32xf32>
    %16 = tpu.matmul %14, %15, %cst_14 {dimension_numbers = #tpu.dot_dimension_numbers<[1], [0], [0], [1], [0, 0, 1, 1], [], []>} : vector<2x256xf32>, vector<256x32xf32>, vector<2x32xf32> -> vector<2x32xf32>
    %c0_15 = arith.constant 0 : index
    %c0_16 = arith.constant 0 : index
    %17 = vector.load %arg6[%c0_15, %c0_16] : memref<1x32xf32, #tpu.memory_space<vmem>>, vector<1x32xf32>
    %18 = vector.broadcast %17 : vector<1x32xf32> to vector<2x32xf32>
    %19 = arith.addf %16, %18 : vector<2x32xf32>
    %c0_17 = arith.constant 0 : index
    %c0_18 = arith.constant 0 : index
    %20 = vector.load %arg7[%c0_17, %c0_18] : memref<2x32xf32, #tpu.memory_space<vmem>>, vector<2x32xf32>
    tpu.vector_store %arg7[%c0_17, %c0_18], %19 {strides = array<i32>} : memref<2x32xf32, #tpu.memory_space<vmem>>, vector<2x32xf32>,
    return
  }
}

</mosaic_0001>

<bundles_post_ra>
// kernel: encoder_forward.1
= control target key start
LH: loop header
LB: loop body
LE: loop exit
PB: predicated region body
PF: predicated region fallthrough
CT: control target
= control target key end

     0   :  { %12 = vsyncpa [#allocation3], 0  ;;  %s2837_s0 = inlined_call_operand.vmem [shape: f32[2,1024], index: 0, kind: input, shape index: {}]   ;;  %s2838_s1 = inlined_call_operand.hbm [shape: f32[1024,512], index: 1, kind: input, shape index: {}]   ;;  %s2839_s2 = inlined_call_operand.hbm [shape: f32[512,256], index: 2, kind: input, shape index: {}]   ;;  %s2840_s3 = inlined_call_operand.vmem [shape: f32[256,32], index: 3, kind: input, shape index: {}]   ;;  %s2841_s4 = inlined_call_operand.hbm [shape: f32[1,512], index: 4, kind: input, shape index: {}]   ;;  %s2842_s5 = inlined_call_operand.hbm [shape: f32[1,256], index: 5, kind: input, shape index: {}]   ;;  %s2843_s6 = inlined_call_operand.hbm [shape: f32[1,32], index: 6, kind: input, shape index: {}]   ;;  %s2844_s7 = inlined_call_operand.hbm [shape: f32[2,32], index: 7, kind: output, shape index: {}]  }
   0x1   :  { %13 = vsyncpa [#allocation6], 0 }
   0x2   :  { %14 = vsyncpa [#allocation9], 0 }
   0x3   :  { %15 = vsyncpa [#allocation4], 0  ;;  %s2534_s24 = smov [#allocation5]   ;;  %s2394_s28 = scalar_lea.hbm %s2839_s2, 16384 }
   0x4   :  { %s35_s25 = sshll.u32 %s2534_s24, 4  ;;  %p2395_p0 = scmp.ne.s32.totalorder %s2839_s2, %s2394_s28  ;;  %s36_s25 = int_to_ptr.vmem [resolvable:$true] %s35_s25 }
   0x5   :  { %p2398_p1 = scmp.lt.u32.totalorder %s2394_s28, %s2839_s2 }
   0x7   :  { %p2400_p2 = pnand %p2398_p1, %p2395_p0 }
   0x9   :  { %2403 = shalt.err (!%p2400_p2)
}
   0xa   :  { %s2404_s10 = scalar_lea.vmem %s36_s25, 16384  ;;  %p2409_p4 = scmp.lt.s32.totalorder %s36_s25, %s36_s25 }
   0xb   :  { %p2405_p3 = scmp.ne.s32.totalorder %s36_s25, %s2404_s10  ;;  %p2410_p5 = scmp.lt.s32.totalorder %s2404_s10, %s2404_s10 }
   0xd   :  { %p2411_p6 = por %p2410_p5, %p2409_p4 }
   0xf   :  { %p2412_p7 = pnand %p2411_p6, %p2405_p3 }
  0x11   :  { %2415 = shalt.err (!%p2412_p7)
}
  0x12   :  { %s2535_s11 = smov 256   ;;  %s2536_s12 = smov 16  }
  0x13   :  { %41 = dma.hbm_to_vmem [thread:$0]  %s2839_s2, 16384, %s36_s25, [#allocation6], %s2535_s11, %s2535_s11, %s2536_s12  }
  0x14   :  { %s2537_s15 = smov [#allocation8]   ;;  %s2538_s17 = smov [#allocation2]  }
  0x15   :  { %s60_s16 = sshll.u32 %s2537_s15, 4  ;;  %s23_s18 = sshll.u32 %s2538_s17, 4  ;;  %s61_s16 = int_to_ptr.vmem [resolvable:$true] %s60_s16  ;;  %s24_s18 = int_to_ptr.vmem [resolvable:$true] %s23_s18 }
  0x16   :  { %s2416_s21 = scalar_lea.hbm %s2842_s5, 32 }
  0x17   :  { %p2417_p8 = scmp.ne.s32.totalorder %s2842_s5, %s2416_s21  ;;  %p2420_p9 = scmp.lt.u32.totalorder %s2416_s21, %s2842_s5 }
  0x19   :  { %p2422_p10 = pnand %p2420_p9, %p2417_p8 }
  0x1b   :  { %2425 = shalt.err (!%p2422_p10)
}
  0x1c   :  { %s2426_s2 = scalar_lea.vmem %s61_s16, 32  ;;  %p2431_p12 = scmp.lt.s32.totalorder %s61_s16, %s61_s16 }
  0x1d   :  { %p2427_p11 = scmp.ne.s32.totalorder %s61_s16, %s2426_s2  ;;  %p2432_p13 = scmp.lt.s32.totalorder %s2426_s2, %s2426_s2 }
  0x1f   :  { %p2433_p0 = por %p2432_p13, %p2431_p12 }
  0x21   :  { %p2434_p1 = pnand %p2433_p0, %p2427_p11 }
  0x23   :  { %2437 = shalt.err (!%p2434_p1)
}
  0x24   :  { %63 = dma.hbm_to_vmem [thread:$0]  %s2842_s5, 32, %s61_s16, [#allocation9]  }
  0x25   :  { %s2438_s30 = scalar_lea.hbm %s2838_s1, 65536 }
  0x26   :  { %p2439_p2 = scmp.ne.s32.totalorder %s2838_s1, %s2438_s30  ;;  %p2442_p3 = scmp.lt.u32.totalorder %s2438_s30, %s2838_s1 }
  0x28   :  { %p2444_p4 = pnand %p2442_p3, %p2439_p2 }
  0x2a   :  { %2447 = shalt.err (!%p2444_p4)
}
  0x2b   :  { %s2448_s12 = scalar_lea.vmem %s24_s18, 65536  ;;  %p2453_p6 = scmp.lt.s32.totalorder %s24_s18, %s24_s18 }
  0x2c   :  { %p2449_p5 = scmp.ne.s32.totalorder %s24_s18, %s2448_s12  ;;  %p2454_p7 = scmp.lt.s32.totalorder %s2448_s12, %s2448_s12 }
  0x2e   :  { %p2455_p8 = por %p2454_p7, %p2453_p6 }
  0x30   :  { %p2456_p9 = pnand %p2455_p8, %p2449_p5 }
  0x32   :  { %2459 = shalt.err (!%p2456_p9)
}
  0x33   :  { %s2539_s5 = smov 512   ;;  %s2540_s13 = smov 32  }
  0x34   :  { %29 = dma.hbm_to_vmem [thread:$0]  %s2838_s1, 65536, %s24_s18, [#allocation3], %s2539_s5, %s2539_s5, %s2540_s13  }
  0x35   :  { %s2541_s16 = smov [#allocation7]   ;;  %s2542_s19 = smov [#allocation10]  }
  0x36   :  { %s50_s17 = sshll.u32 %s2541_s16, 4  ;;  %s70_s20 = sshll.u32 %s2542_s19, 4  ;;  %s51_s17 = int_to_ptr.vmem [resolvable:$true] %s50_s17  ;;  %s71_s20 = int_to_ptr.vmem [resolvable:$true] %s70_s20 }
  0x37   :  { %s2460_s23 = scalar_lea.hbm %s2841_s4, 64 }
  0x38   :  { %p2461_p10 = scmp.ne.s32.totalorder %s2841_s4, %s2460_s23  ;;  %p2464_p11 = scmp.lt.u32.totalorder %s2460_s23, %s2841_s4 }
  0x3a   :  { %p2466_p12 = pnand %p2464_p11, %p2461_p10 }
  0x3c   :  { %2469 = shalt.err (!%p2466_p12)
}
  0x3d   :  { %s2470_s1 = scalar_lea.vmem %s51_s17, 64  ;;  %p2475_p0 = scmp.lt.s32.totalorder %s51_s17, %s51_s17 }
  0x3e   :  { %p2471_p13 = scmp.ne.s32.totalorder %s51_s17, %s2470_s1  ;;  %p2476_p1 = scmp.lt.s32.totalorder %s2470_s1, %s2470_s1 }
  0x40   :  { %p2477_p2 = por %p2476_p1, %p2475_p0 }
  0x42   :  { %p2478_p3 = pnand %p2477_p2, %p2471_p13 }
  0x44   :  { %2481 = shalt.err (!%p2478_p3)
}
  0x45   :  { %53 = dma.hbm_to_vmem [thread:$0]  %s2841_s4, 64, %s51_s17, [#allocation6]  }
  0x46   :  { %s2482_s30 = scalar_lea.hbm %s2843_s6, 16 }
  0x47   :  { %p2483_p4 = scmp.ne.s32.totalorder %s2843_s6, %s2482_s30  ;;  %p2486_p5 = scmp.lt.u32.totalorder %s2482_s30, %s2843_s6 }
  0x49   :  { %p2488_p6 = pnand %p2486_p5, %p2483_p4 }
  0x4b   :  { %2491 = shalt.err (!%p2488_p6)
}
  0x4c   :  { %s2492_s12 = scalar_lea.vmem %s71_s20, 16  ;;  %s2496_s5 = scalar_lea.vmem %s71_s20, 32 }
  0x4d   :  { %p2493_p7 = scmp.ne.s32.totalorder %s71_s20, %s2492_s12  ;;  %p2497_p8 = scmp.lt.s32.totalorder %s71_s20, %s71_s20 }
  0x4e   :  { %p2498_p9 = scmp.lt.s32.totalorder %s2496_s5, %s2492_s12 }
  0x50   :  { %p2499_p10 = por %p2498_p9, %p2497_p8 }
  0x52   :  { %p2500_p11 = pnand %p2499_p10, %p2493_p7 }
  0x54   :  { %2503 = shalt.err (!%p2500_p11)
}
  0x55   :  { %73 = dma.hbm_to_vmem [thread:$0]  %s2843_s6, 16, %s71_s20, [#allocation9]  }
  0x56   :  { %2526 = dma.done.wait [#allocation3], 65536  }
  0x57   :  { %2527 = vsyncadd [#allocation3], 4294901760 }
  0x58   :  { %2528 = dma.done.wait [#allocation6], 16448  }
  0x59   :  { %2529 = vsyncadd [#allocation6], 4294950848 }
  0x5a   :  { %2530 = dma.done.wait [#allocation9], 48  }
  0x5b   :  { %2531 = vsyncadd [#allocation9], 4294967248  ;;  %v92_v0 = vld [vmem:[#allocation2 + $0x8] sm:$0xff]  ;;  %v91_v5 = vld [vmem:[#allocation2] sm:$0xff]  ;;  %vm1634_vm0 = vcmask 254976  }
  0x5c   :  { %v96_v1 = vld [vmem:[#allocation2 + $0x28] sm:$0xff]  ;;  %v95_v6 = vld [vmem:[#allocation2 + $0x20] sm:$0xff] }
  0x5d   :  { %v220_v2 = vld [vmem:[#allocation2 + $0x408] sm:$0xff]  ;;  %v1689_v3 = vpack.c.bf16 %v96_v1, %v92_v0  ;;  %v1691_v8 = vpack.c.bf16 %v95_v6, %v91_v5  ;;  %v219_v9 = vld [vmem:[#allocation2 + $0x400] sm:$0xff] }
  0x5e   :  { %v224_v4 = vld [vmem:[#allocation2 + $0x428] sm:$0xff]  ;;  %v223_v10 = vld [vmem:[#allocation2 + $0x420] sm:$0xff] }
  0x5f   :  { %v1753_v7 = vpack.c.bf16 %v224_v4, %v220_v2  ;;  %v100_v11 = vld [vmem:[#allocation2 + $0x48] sm:$0xff]  ;;  %1690 = vmatprep.subr.bf16.mxu1 %v1689_v3  ;;  %v1755_v12 = vpack.c.bf16 %v223_v10, %v219_v9  ;;  %v99_v18 = vld [vmem:[#allocation2 + $0x40] sm:$0xff] }
  0x60   :  { %v104_v13 = vld [vmem:[#allocation2 + $0x68] sm:$0xff]  ;;  %1692 = vmatpush1.bf16.msra.mxu1 %v1691_v8  ;;  %v103_v19 = vld [vmem:[#allocation2 + $0x60] sm:$0xff] }
  0x61   :  { %v228_v14 = vld [vmem:[#allocation2 + $0x448] sm:$0xff]  ;;  %1754 = vmatprep.subr.bf16.mxu0 %v1753_v7  ;;  %v1693_v16 = vpack.c.bf16 %v104_v13, %v100_v11  ;;  %v227_v20 = vld [vmem:[#allocation2 + $0x440] sm:$0xff]  ;;  %v1695_v21 = vpack.c.bf16 %v103_v19, %v99_v18 }
  0x62   :  { %v232_v15 = vld [vmem:[#allocation2 + $0x468] sm:$0xff]  ;;  %1756 = vmatpush1.bf16.msra.mxu0 %v1755_v12  ;;  %v231_v22 = vld [vmem:[#allocation2 + $0x460] sm:$0xff] }
  0x63   :  { %v1757_v17 = vpack.c.bf16 %v232_v15, %v228_v14  ;;  %v108_v23 = vld [vmem:[#allocation2 + $0x88] sm:$0xff]  ;;  %1694 = vmatprep.subr.bf16.mxu1 %v1693_v16  ;;  %v1759_v25 = vpack.c.bf16 %v231_v22, %v227_v20  ;;  %v107_v29 = vld [vmem:[#allocation2 + $0x80] sm:$0xff] }
  0x64   :  { %v112_v24 = vld [vmem:[#allocation2 + $0xa8] sm:$0xff]  ;;  %v111_v31 = vld [vmem:[#allocation2 + $0xa0] sm:$0xff]  ;;  %1696 = vmatpush1.bf16.msra.mxu1 %v1695_v21 }
  0x65   :  { %1758 = vmatprep.subr.bf16.mxu0 %v1757_v17  ;;  %v1697_v26 = vpack.c.bf16 %v112_v24, %v108_v23  ;;  %v236_v27 = vld [vmem:[#allocation2 + $0x488] sm:$0xff]  ;;  %v235_v32 = vld [vmem:[#allocation2 + $0x480] sm:$0xff]  ;;  %v1699_v34 = vpack.c.bf16 %v111_v31, %v107_v29 }
  0x66   :  { %v240_v28 = vld [vmem:[#allocation2 + $0x4a8] sm:$0xff]  ;;  %v239_v33 = vld [vmem:[#allocation2 + $0x4a0] sm:$0xff]  ;;  %1760 = vmatpush1.bf16.msra.mxu0 %v1759_v25 }
  0x67   :  { %v1761_v30 = vpack.c.bf16 %v240_v28, %v236_v27  ;;  %v116_v35 = vld [vmem:[#allocation2 + $0xc8] sm:$0xff]  ;;  %1698 = vmatprep.subr.bf16.mxu1 %v1697_v26  ;;  %v1763_v38 = vpack.c.bf16 %v239_v33, %v235_v32  ;;  %v115_v41 = vld [vmem:[#allocation2 + $0xc0] sm:$0xff] }
  0x68   :  { %v120_v36 = vld [vmem:[#allocation2 + $0xe8] sm:$0xff]  ;;  %v119_v42 = vld [vmem:[#allocation2 + $0xe0] sm:$0xff]  ;;  %1700 = vmatpush1.bf16.msra.mxu1 %v1699_v34 }
  0x69   :  { %v244_v37 = vld [vmem:[#allocation2 + $0x4c8] sm:$0xff]  ;;  %v1701_v39 = vpack.c.bf16 %v120_v36, %v116_v35  ;;  %1762 = vmatprep.subr.bf16.mxu0 %v1761_v30  ;;  %v243_v44 = vld [vmem:[#allocation2 + $0x4c0] sm:$0xff]  ;;  %v1703_v50 = vpack.c.bf16 %v119_v42, %v115_v41 }
  0x6a   :  { %v248_v40 = vld [vmem:[#allocation2 + $0x4e8] sm:$0xff]  ;;  %v247_v45 = vld [vmem:[#allocation2 + $0x4e0] sm:$0xff]  ;;  %1764 = vmatpush1.bf16.msra.mxu0 %v1763_v38 }
  0x6b   :  { %v1765_v43 = vpack.c.bf16 %v248_v40, %v244_v37  ;;  %v124_v46 = vld [vmem:[#allocation2 + $0x108] sm:$0xff]  ;;  %1702 = vmatprep.subr.bf16.mxu1 %v1701_v39  ;;  %v1767_v51 = vpack.c.bf16 %v247_v45, %v243_v44  ;;  %v123_v53 = vld [vmem:[#allocation2 + $0x100] sm:$0xff] }
  0x6c   :  { %v128_v47 = vld [vmem:[#allocation2 + $0x128] sm:$0xff]  ;;  %v127_v54 = vld [vmem:[#allocation2 + $0x120] sm:$0xff]  ;;  %1704 = vmatpush1.bf16.msra.mxu1 %v1703_v50 }
  0x6d   :  { %v252_v48 = vld [vmem:[#allocation2 + $0x508] sm:$0xff]  ;;  %v1705_v52 = vpack.c.bf16 %v128_v47, %v124_v46  ;;  %v251_v55 = vld [vmem:[#allocation2 + $0x500] sm:$0xff]  ;;  %1766 = vmatprep.subr.bf16.mxu0 %v1765_v43  ;;  %v1707_v62 = vpack.c.bf16 %v127_v54, %v123_v53  ;;  %v605_v46 = vlaneseq  ;;  %v2543_v47 = vmov 1983009808  }
  0x6e   :  { %v256_v49 = vld [vmem:[#allocation2 + $0x528] sm:$0xff]  ;;  %v255_v57 = vld [vmem:[#allocation2 + $0x520] sm:$0xff]  ;;  %1768 = vmatpush1.bf16.msra.mxu0 %v1767_v51 }
  0x6f   :  { %v1769_v56 = vpack.c.bf16 %v256_v49, %v252_v48  ;;  %v132_v58 = vld [vmem:[#allocation2 + $0x148] sm:$0xff]  ;;  %1706 = vmatprep.subr.bf16.mxu1 %v1705_v52  ;;  %v1771_v63 = vpack.c.bf16 %v255_v57, %v251_v55  ;;  %v131_v1 = vld [vmem:[#allocation2 + $0x140] sm:$0xff]  ;;  %v629_v48 = vunpack.c.l.s4 %v2543_v47 }
  0x70   :  { %v136_v59 = vld [vmem:[#allocation2 + $0x168] sm:$0xff]  ;;  %v135_v2 = vld [vmem:[#allocation2 + $0x160] sm:$0xff]  ;;  %1708 = vmatpush1.bf16.msra.mxu1 %v1707_v62 }
  0x71   :  { %v260_v60 = vld [vmem:[#allocation2 + $0x548] sm:$0xff]  ;;  %v1709_v0 = vpack.c.bf16 %v136_v59, %v132_v58  ;;  %v259_v3 = vld [vmem:[#allocation2 + $0x540] sm:$0xff]  ;;  %1770 = vmatprep.subr.bf16.mxu0 %v1769_v56  ;;  %v1711_v10 = vpack.c.bf16 %v135_v2, %v131_v1  ;;  %v630_v62 = vunpack.c.0.s8 %v629_v48 }
  0x72   :  { %v264_v61 = vld [vmem:[#allocation2 + $0x568] sm:$0xff]  ;;  %v263_v5 = vld [vmem:[#allocation2 + $0x560] sm:$0xff]  ;;  %1772 = vmatpush1.bf16.msra.mxu0 %v1771_v63 }
  0x73   :  { %v1773_v4 = vpack.c.bf16 %v264_v61, %v260_v60  ;;  %v140_v6 = vld [vmem:[#allocation2 + $0x188] sm:$0xff]  ;;  %1710 = vmatprep.subr.bf16.mxu1 %v1709_v0  ;;  %v1775_v11 = vpack.c.bf16 %v263_v5, %v259_v3  ;;  %v139_v13 = vld [vmem:[#allocation2 + $0x180] sm:$0xff]  ;;  %v2645_v61 = vshrl.u32 %v605_v46, 7 }
  0x74   :  { %v144_v7 = vld [vmem:[#allocation2 + $0x1a8] sm:$0xff]  ;;  %v143_v14 = vld [vmem:[#allocation2 + $0x1a0] sm:$0xff]  ;;  %1712 = vmatpush1.bf16.msra.mxu1 %v1711_v10 }
  0x75   :  { %v268_v8 = vld [vmem:[#allocation2 + $0x588] sm:$0xff]  ;;  %v1713_v12 = vpack.c.bf16 %v144_v7, %v140_v6  ;;  %v267_v15 = vld [vmem:[#allocation2 + $0x580] sm:$0xff]  ;;  %1774 = vmatprep.subr.bf16.mxu0 %v1773_v4  ;;  %v1715_v22 = vpack.c.bf16 %v143_v14, %v139_v13 }
  0x76   :  { %v272_v9 = vld [vmem:[#allocation2 + $0x5a8] sm:$0xff]  ;;  %v271_v17 = vld [vmem:[#allocation2 + $0x5a0] sm:$0xff]  ;;  %1776 = vmatpush1.bf16.msra.mxu0 %v1775_v11  ;;  %v2648_v11 = vsub.s32 %v630_v62, %v2645_v61 }
  0x77   :  { %v1777_v16 = vpack.c.bf16 %v272_v9, %v268_v8  ;;  %v148_v18 = vld [vmem:[#allocation2 + $0x1c8] sm:$0xff]  ;;  %1714 = vmatprep.subr.bf16.mxu1 %v1713_v12  ;;  %v1779_v23 = vpack.c.bf16 %v271_v17, %v267_v15  ;;  %v147_v25 = vld [vmem:[#allocation2 + $0x1c0] sm:$0xff] }
  0x78   :  { %v152_v19 = vld [vmem:[#allocation2 + $0x1e8] sm:$0xff]  ;;  %v151_v26 = vld [vmem:[#allocation2 + $0x1e0] sm:$0xff]  ;;  %1716 = vmatpush1.bf16.msra.mxu1 %v1715_v22 }
  0x79   :  { %v276_v20 = vld [vmem:[#allocation2 + $0x5c8] sm:$0xff]  ;;  %v1717_v24 = vpack.c.bf16 %v152_v19, %v148_v18  ;;  %v275_v27 = vld [vmem:[#allocation2 + $0x5c0] sm:$0xff]  ;;  %1778 = vmatprep.subr.bf16.mxu0 %v1777_v16  ;;  %v1719_v34 = vpack.c.bf16 %v151_v26, %v147_v25 }
  0x7a   :  { %v280_v21 = vld [vmem:[#allocation2 + $0x5e8] sm:$0xff]  ;;  %v279_v29 = vld [vmem:[#allocation2 + $0x5e0] sm:$0xff]  ;;  %1780 = vmatpush1.bf16.msra.mxu0 %v1779_v23 }
  0x7b   :  { %v1781_v28 = vpack.c.bf16 %v280_v21, %v276_v20  ;;  %v156_v30 = vld [vmem:[#allocation2 + $0x208] sm:$0xff]  ;;  %1718 = vmatprep.subr.bf16.mxu1 %v1717_v24  ;;  %v1783_v35 = vpack.c.bf16 %v279_v29, %v275_v27  ;;  %v155_v37 = vld [vmem:[#allocation2 + $0x200] sm:$0xff] }
  0x7c   :  { %v160_v31 = vld [vmem:[#allocation2 + $0x228] sm:$0xff]  ;;  %v159_v38 = vld [vmem:[#allocation2 + $0x220] sm:$0xff]  ;;  %1720 = vmatpush1.bf16.msra.mxu1 %v1719_v34 }
  0x7d   :  { %v284_v32 = vld [vmem:[#allocation2 + $0x608] sm:$0xff]  ;;  %v1721_v36 = vpack.c.bf16 %v160_v31, %v156_v30  ;;  %v283_v39 = vld [vmem:[#allocation2 + $0x600] sm:$0xff]  ;;  %1782 = vmatprep.subr.bf16.mxu0 %v1781_v28  ;;  %v1723_v49 = vpack.c.bf16 %v159_v38, %v155_v37 }
  0x7e   :  { %v288_v33 = vld [vmem:[#allocation2 + $0x628] sm:$0xff]  ;;  %v287_v41 = vld [vmem:[#allocation2 + $0x620] sm:$0xff]  ;;  %1784 = vmatpush1.bf16.msra.mxu0 %v1783_v35 }
  0x7f   :  { %v1785_v40 = vpack.c.bf16 %v288_v33, %v284_v32  ;;  %v164_v42 = vld [vmem:[#allocation2 + $0x248] sm:$0xff]  ;;  %1722 = vmatprep.subr.bf16.mxu1 %v1721_v36  ;;  %v1787_v50 = vpack.c.bf16 %v287_v41, %v283_v39  ;;  %v163_v52 = vld [vmem:[#allocation2 + $0x240] sm:$0xff] }
  0x80   :  { %v168_v43 = vld [vmem:[#allocation2 + $0x268] sm:$0xff]  ;;  %v167_v53 = vld [vmem:[#allocation2 + $0x260] sm:$0xff]  ;;  %1724 = vmatpush1.bf16.msra.mxu1 %v1723_v49 }
  0x81   :  { %v292_v44 = vld [vmem:[#allocation2 + $0x648] sm:$0xff]  ;;  %v1725_v51 = vpack.c.bf16 %v168_v43, %v164_v42  ;;  %v291_v54 = vld [vmem:[#allocation2 + $0x640] sm:$0xff]  ;;  %1786 = vmatprep.subr.bf16.mxu0 %v1785_v40  ;;  %v1727_v63 = vpack.c.bf16 %v167_v53, %v163_v52 }
  0x82   :  { %v296_v45 = vld [vmem:[#allocation2 + $0x668] sm:$0xff]  ;;  %v295_v56 = vld [vmem:[#allocation2 + $0x660] sm:$0xff]  ;;  %1788 = vmatpush1.bf16.msra.mxu0 %v1787_v50 }
  0x83   :  { %v1789_v55 = vpack.c.bf16 %v296_v45, %v292_v44  ;;  %v172_v57 = vld [vmem:[#allocation2 + $0x288] sm:$0xff]  ;;  %1726 = vmatprep.subr.bf16.mxu1 %v1725_v51  ;;  %v1791_v0 = vpack.c.bf16 %v295_v56, %v291_v54  ;;  %v171_v2 = vld [vmem:[#allocation2 + $0x280] sm:$0xff] }
  0x84   :  { %v176_v58 = vld [vmem:[#allocation2 + $0x2a8] sm:$0xff]  ;;  %v175_v3 = vld [vmem:[#allocation2 + $0x2a0] sm:$0xff]  ;;  %1728 = vmatpush1.bf16.msra.mxu1 %v1727_v63 }
  0x85   :  { %v300_v59 = vld [vmem:[#allocation2 + $0x688] sm:$0xff]  ;;  %v1729_v1 = vpack.c.bf16 %v176_v58, %v172_v57  ;;  %v299_v4 = vld [vmem:[#allocation2 + $0x680] sm:$0xff]  ;;  %1790 = vmatprep.subr.bf16.mxu0 %v1789_v55  ;;  %v1731_v12 = vpack.c.bf16 %v175_v3, %v171_v2 }
  0x86   :  { %v304_v60 = vld [vmem:[#allocation2 + $0x6a8] sm:$0xff]  ;;  %v303_v6 = vld [vmem:[#allocation2 + $0x6a0] sm:$0xff]  ;;  %1792 = vmatpush1.bf16.msra.mxu0 %v1791_v0 }
  0x87   :  { %v1793_v5 = vpack.c.bf16 %v304_v60, %v300_v59  ;;  %v180_v7 = vld [vmem:[#allocation2 + $0x2c8] sm:$0xff]  ;;  %v179_v13 = vld [vmem:[#allocation2 + $0x2c0] sm:$0xff]  ;;  %1730 = vmatprep.subr.bf16.mxu1 %v1729_v1  ;;  %v1795_v14 = vpack.c.bf16 %v303_v6, %v299_v4 }
  0x88   :  { %v184_v8 = vld [vmem:[#allocation2 + $0x2e8] sm:$0xff]  ;;  %v183_v16 = vld [vmem:[#allocation2 + $0x2e0] sm:$0xff]  ;;  %1732 = vmatpush1.bf16.msra.mxu1 %v1731_v12  ;;  %v94_v12 = vld [vmem:[#allocation2 + $0x18] sm:$0xff] }
  0x89   :  { %v308_v9 = vld [vmem:[#allocation2 + $0x6c8] sm:$0xff]  ;;  %v1733_v15 = vpack.c.bf16 %v184_v8, %v180_v7  ;;  %v307_v17 = vld [vmem:[#allocation2 + $0x6c0] sm:$0xff]  ;;  %1794 = vmatprep.subr.bf16.mxu0 %v1793_v5  ;;  %v1735_v27 = vpack.c.bf16 %v183_v16, %v179_v13  ;;  %v98_v13 = vld [vmem:[#allocation2 + $0x38] sm:$0xff] }
  0x8a   :  { %v312_v10 = vld [vmem:[#allocation2 + $0x6e8] sm:$0xff]  ;;  %v311_v18 = vld [vmem:[#allocation2 + $0x6e0] sm:$0xff]  ;;  %1796 = vmatpush1.bf16.msra.mxu0 %v1795_v14 }
  0x8b   :  { %v1797_v19 = vpack.c.bf16 %v312_v10, %v308_v9  ;;  %v188_v20 = vld [vmem:[#allocation2 + $0x308] sm:$0xff]  ;;  %v89_v22 = vld [vmem:[%s2837_s0] sm:$0xff]  ;;  %v1799_v28 = vpack.c.bf16 %v311_v18, %v307_v17  ;;  %1734 = vmatprep.subr.bf16.mxu1 %v1733_v15  ;;  %v1945_v18 = vpack.c.bf16 %v98_v13, %v94_v12  ;;  %v134_v13 = vld [vmem:[#allocation2 + $0x158] sm:$0xff] }
  0x8c   :  { %v192_v21 = vld [vmem:[#allocation2 + $0x328] sm:$0xff]  ;;  %v2654_v25 = vrot.slane %v89_v22, %v2648_v11  ;;  %v627_v26 = vcombine.high %v89_v22, %v89_v22  ;;  %v187_v30 = vld [vmem:[#allocation2 + $0x300] sm:$0xff]  ;;  %1736 = vmatpush1.bf16.msra.mxu1 %v1735_v27 }
  0x8d   :  { %v316_v23 = vld [vmem:[#allocation2 + $0x708] sm:$0xff]  ;;  %v1737_v29 = vpack.c.bf16 %v192_v21, %v188_v20  ;;  %v191_v31 = vld [vmem:[#allocation2 + $0x320] sm:$0xff]  ;;  %1798 = vmatprep.subr.bf16.mxu0 %v1797_v19  ;;  %v93_v20 = vld [vmem:[#allocation2 + $0x10] sm:$0xff] }
  0x8e   :  { %v320_v24 = vld [vmem:[#allocation2 + $0x728] sm:$0xff]  ;;  %v315_v32 = vld [vmem:[#allocation2 + $0x700] sm:$0xff]  ;;  %v2658_v33 = vcombine.high %v2654_v25, %v2654_v25  ;;  %v2661_v34 = vrot.slane %v627_v26, %v2648_v11  ;;  %v1739_v42 = vpack.c.bf16 %v191_v31, %v187_v30  ;;  %1800 = vmatpush1.bf16.msra.mxu0 %v1799_v28  ;;  %v97_v21 = vld [vmem:[#allocation2 + $0x30] sm:$0xff] }
  0x8f   :  { %v1801_v35 = vpack.c.bf16 %v320_v24, %v316_v23  ;;  %v319_v36 = vld [vmem:[#allocation2 + $0x720] sm:$0xff]  ;;  %v196_v37 = vld [vmem:[#allocation2 + $0x348] sm:$0xff]  ;;  %1738 = vmatprep.subr.bf16.mxu1 %v1737_v29  ;;  %v102_v24 = vld [vmem:[#allocation2 + $0x58] sm:$0xff]  ;;  %v1947_v29 = vpack.c.bf16 %v97_v21, %v93_v20 }
  0x90   :  { %v200_v38 = vld [vmem:[#allocation2 + $0x368] sm:$0xff]  ;;  %733 = vmatprep.mubr.f32.mxu1 %v2658_v33  ;;  %v2666_v41 = vcombine.high %v2661_v34, %v2661_v34  ;;  %v1803_v43 = vpack.c.bf16 %v319_v36, %v315_v32  ;;  %v195_v45 = vld [vmem:[#allocation2 + $0x340] sm:$0xff]  ;;  %1740 = vmatpush1.bf16.msra.mxu1 %v1739_v42  ;;  %v106_v26 = vld [vmem:[#allocation2 + $0x78] sm:$0xff] }
  0x91   :  { %v324_v39 = vld [vmem:[#allocation2 + $0x748] sm:$0xff]  ;;  %v1741_v44 = vpack.c.bf16 %v200_v38, %v196_v37  ;;  %v199_v46 = vld [vmem:[#allocation2 + $0x360] sm:$0xff]  ;;  %1802 = vmatprep.subr.bf16.mxu0 %v1801_v35  ;;  %v1949_v31 = vpack.c.bf16 %v106_v26, %v102_v24  ;;  %v101_v35 = vld [vmem:[#allocation2 + $0x50] sm:$0xff] }
  0x92   :  { %v328_v40 = vld [vmem:[#allocation2 + $0x768] sm:$0xff]  ;;  %v323_v47 = vld [vmem:[#allocation2 + $0x740] sm:$0xff]  ;;  %804 = vmatprep.mubr.f32.mxu0 %v2666_v41  ;;  %v1743_v54 = vpack.c.bf16 %v199_v46, %v195_v45  ;;  %1804 = vmatpush1.bf16.msra.mxu0 %v1803_v43  ;;  %v105_v36 = vld [vmem:[#allocation2 + $0x70] sm:$0xff] }
  0x93   :  { %v1805_v48 = vpack.c.bf16 %v328_v40, %v324_v39  ;;  %v327_v49 = vld [vmem:[#allocation2 + $0x760] sm:$0xff]  ;;  %v204_v50 = vld [vmem:[#allocation2 + $0x388] sm:$0xff]  ;;  %1742 = vmatprep.subr.bf16.mxu1 %v1741_v44  ;;  %v110_v39 = vld [vmem:[#allocation2 + $0x98] sm:$0xff]  ;;  %v1951_v44 = vpack.c.bf16 %v105_v36, %v101_v35 }
  0x94   :  { %v208_v51 = vld [vmem:[#allocation2 + $0x3a8] sm:$0xff]  ;;  %v1807_v55 = vpack.c.bf16 %v327_v49, %v323_v47  ;;  %v203_v57 = vld [vmem:[#allocation2 + $0x380] sm:$0xff]  ;;  %1744 = vmatpush1.bf16.msra.mxu1 %v1743_v54  ;;  %v114_v40 = vld [vmem:[#allocation2 + $0xb8] sm:$0xff] }
  0x95   :  { %v332_v52 = vld [vmem:[#allocation2 + $0x788] sm:$0xff]  ;;  %v1745_v56 = vpack.c.bf16 %v208_v51, %v204_v50  ;;  %v207_v58 = vld [vmem:[#allocation2 + $0x3a0] sm:$0xff]  ;;  %1806 = vmatprep.subr.bf16.mxu0 %v1805_v48  ;;  %v1953_v46 = vpack.c.bf16 %v114_v40, %v110_v39  ;;  %v109_v48 = vld [vmem:[#allocation2 + $0x90] sm:$0xff] }
  0x96   :  { %v336_v53 = vld [vmem:[#allocation2 + $0x7a8] sm:$0xff]  ;;  %v331_v59 = vld [vmem:[#allocation2 + $0x780] sm:$0xff]  ;;  %v1747_v3 = vpack.c.bf16 %v207_v58, %v203_v57  ;;  %1808 = vmatpush1.bf16.msra.mxu0 %v1807_v55  ;;  %v113_v49 = vld [vmem:[#allocation2 + $0xb0] sm:$0xff] }
  0x97   :  { %v1809_v60 = vpack.c.bf16 %v336_v53, %v332_v52  ;;  %v335_v62 = vld [vmem:[#allocation2 + $0x7a0] sm:$0xff]  ;;  %v212_v63 = vld [vmem:[#allocation2 + $0x3c8] sm:$0xff]  ;;  %1746 = vmatprep.subr.bf16.mxu1 %v1745_v56  ;;  %v118_v52 = vld [vmem:[#allocation2 + $0xd8] sm:$0xff]  ;;  %v1955_v56 = vpack.c.bf16 %v113_v49, %v109_v48 }
  0x98   :  { %v216_v0 = vld [vmem:[#allocation2 + $0x3e8] sm:$0xff]  ;;  %v1811_v4 = vpack.c.bf16 %v335_v62, %v331_v59  ;;  %v211_v6 = vld [vmem:[#allocation2 + $0x3c0] sm:$0xff]  ;;  %1748 = vmatpush1.bf16.msra.mxu1 %v1747_v3  ;;  %v122_v53 = vld [vmem:[#allocation2 + $0xf8] sm:$0xff] }
  0x99   :  { %v340_v1 = vld [vmem:[#allocation2 + $0x7c8] sm:$0xff]  ;;  %v1749_v5 = vpack.c.bf16 %v216_v0, %v212_v63  ;;  %v215_v7 = vld [vmem:[#allocation2 + $0x3e0] sm:$0xff]  ;;  %1810 = vmatprep.subr.bf16.mxu0 %v1809_v60  ;;  %v1957_v58 = vpack.c.bf16 %v122_v53, %v118_v52  ;;  %v117_v60 = vld [vmem:[#allocation2 + $0xd0] sm:$0xff] }
  0x9a   :  { %v344_v2 = vld [vmem:[#allocation2 + $0x7e8] sm:$0xff]  ;;  %v339_v8 = vld [vmem:[#allocation2 + $0x7c0] sm:$0xff]  ;;  %v1751_v16 = vpack.c.bf16 %v215_v7, %v211_v6  ;;  %1812 = vmatpush1.bf16.msra.mxu0 %v1811_v4  ;;  %v121_v62 = vld [vmem:[#allocation2 + $0xf0] sm:$0xff] }
  0x9b   :  { %v1813_v9 = vpack.c.bf16 %v344_v2, %v340_v1  ;;  %v343_v10 = vld [vmem:[#allocation2 + $0x7e0] sm:$0xff]  ;;  %v348_v14 = vld [vmem:[#allocation2 + $0x808] sm:$0xff]  ;;  %1750 = vmatprep.subr.bf16.mxu1 %v1749_v5  ;;  %v126_v1 = vld [vmem:[#allocation2 + $0x118] sm:$0xff] }
  0x9c   :  { %v352_v15 = vld [vmem:[#allocation2 + $0x828] sm:$0xff]  ;;  %v1815_v17 = vpack.c.bf16 %v343_v10, %v339_v8  ;;  %v347_v19 = vld [vmem:[#allocation2 + $0x800] sm:$0xff]  ;;  %1752 = vmatpush1.bf16.msra.mxu1 %v1751_v16  ;;  %v130_v2 = vld [vmem:[#allocation2 + $0x138] sm:$0xff] }
  0x9d   :  { %1814 = vmatprep.subr.bf16.mxu0 %v1813_v9  ;;  %v1817_v22 = vpack.c.bf16 %v352_v15, %v348_v14  ;;  %v351_v23 = vld [vmem:[#allocation2 + $0x820] sm:$0xff]  ;;  %v356_v27 = vld [vmem:[#allocation2 + $0x848] sm:$0xff]  ;;  %1946 = vmatprep.subr.bf16.mxu1 %v1945_v18  ;;  %v1961_v6 = vpack.c.bf16 %v130_v2, %v126_v1  ;;  %v125_v8 = vld [vmem:[#allocation2 + $0x110] sm:$0xff] }
  0x9e   :  { %v360_v28 = vld [vmem:[#allocation2 + $0x868] sm:$0xff]  ;;  %1816 = vmatpush1.bf16.msra.mxu0 %v1815_v17  ;;  %v1819_v30 = vpack.c.bf16 %v351_v23, %v347_v19  ;;  %v355_v32 = vld [vmem:[#allocation2 + $0x840] sm:$0xff]  ;;  %v129_v9 = vld [vmem:[#allocation2 + $0x130] sm:$0xff] }
  0x9f   :  { %1818 = vmatprep.subr.bf16.mxu0 %v1817_v22  ;;  %v1821_v37 = vpack.c.bf16 %v360_v28, %v356_v27  ;;  %v359_v38 = vld [vmem:[#allocation2 + $0x860] sm:$0xff]  ;;  %734 = vmatmul.mubr.f32.vlgmr.msra.gmra.mrb[0].mxu1 %v2654_v25  ;;  %v364_v42 = vld [vmem:[#allocation2 + $0x888] sm:$0xff]  ;;  %v138_v14 = vld [vmem:[#allocation2 + $0x178] sm:$0xff]  ;;  %v1963_v17 = vpack.c.bf16 %v129_v9, %v125_v8 }
  0xa0   :  { %v368_v43 = vld [vmem:[#allocation2 + $0x8a8] sm:$0xff]  ;;  %1948 = vmatpush1.bf16.msra.mxu1 %v1947_v29  ;;  %v1823_v45 = vpack.c.bf16 %v359_v38, %v355_v32  ;;  %v363_v47 = vld [vmem:[#allocation2 + $0x880] sm:$0xff]  ;;  %1017 = vmatprep.mubr.f32.mxu1 %v2658_v33  ;;  %v1959_v33 = vpack.c.bf16 %v121_v62, %v117_v60  ;;  %v1965_v19 = vpack.c.bf16 %v138_v14, %v134_v13  ;;  %v133_v21 = vld [vmem:[#allocation2 + $0x150] sm:$0xff] }
  0xa1   :  { %805 = vmatmul.mubr.f32.vlgmr.msra.gmra.mrb[0].mxu0 %v2661_v34  ;;  %1950 = vmatprep.subr.bf16.mxu1 %v1949_v31  ;;  %v1825_v50 = vpack.c.bf16 %v368_v43, %v364_v42  ;;  %v367_v51 = vld [vmem:[#allocation2 + $0x8a0] sm:$0xff]  ;;  %v372_v54 = vld [vmem:[#allocation2 + $0x8c8] sm:$0xff]  ;;  %v137_v22 = vld [vmem:[#allocation2 + $0x170] sm:$0xff] }
  0xa2   :  { %1820 = vmatpush1.bf16.msra.mxu0 %v1819_v30  ;;  %v376_v55 = vld [vmem:[#allocation2 + $0x8e8] sm:$0xff]  ;;  %v1827_v57 = vpack.c.bf16 %v367_v51, %v363_v47  ;;  %v371_v59 = vld [vmem:[#allocation2 + $0x8c0] sm:$0xff]  ;;  %v142_v26 = vld [vmem:[#allocation2 + $0x198] sm:$0xff]  ;;  %v1967_v30 = vpack.c.bf16 %v137_v22, %v133_v21 }
  0xa3   :  { %1822 = vmatprep.subr.bf16.mxu0 %v1821_v37  ;;  %v1829_v63 = vpack.c.bf16 %v376_v55, %v372_v54  ;;  %v375_v0 = vld [vmem:[#allocation2 + $0x8e0] sm:$0xff]  ;;  %v380_v3 = vld [vmem:[#allocation2 + $0x908] sm:$0xff]  ;;  %v146_v27 = vld [vmem:[#allocation2 + $0x1b8] sm:$0xff] }
  0xa4   :  { %1952 = vmatpush1.bf16.msra.mxu1 %v1951_v44  ;;  %v384_v4 = vld [vmem:[#allocation2 + $0x928] sm:$0xff]  ;;  %v1831_v5 = vpack.c.bf16 %v375_v0, %v371_v59  ;;  %v379_v7 = vld [vmem:[#allocation2 + $0x900] sm:$0xff]  ;;  %v1969_v35 = vpack.c.bf16 %v146_v27, %v142_v26  ;;  %v141_v36 = vld [vmem:[#allocation2 + $0x190] sm:$0xff] }
  0xa5   :  { %1954 = vmatprep.subr.bf16.mxu1 %v1953_v46  ;;  %v1833_v10 = vpack.c.bf16 %v384_v4, %v380_v3  ;;  %v383_v12 = vld [vmem:[#allocation2 + $0x920] sm:$0xff]  ;;  %v388_v15 = vld [vmem:[#allocation2 + $0x948] sm:$0xff]  ;;  %v145_v37 = vld [vmem:[#allocation2 + $0x1b0] sm:$0xff] }
  0xa6   :  { %1824 = vmatpush1.bf16.msra.mxu0 %v1823_v45  ;;  %v392_v16 = vld [vmem:[#allocation2 + $0x968] sm:$0xff]  ;;  %v1835_v18 = vpack.c.bf16 %v383_v12, %v379_v7  ;;  %v387_v20 = vld [vmem:[#allocation2 + $0x940] sm:$0xff]  ;;  %v150_v42 = vld [vmem:[#allocation2 + $0x1d8] sm:$0xff]  ;;  %v1971_v47 = vpack.c.bf16 %v145_v37, %v141_v36 }
  0xa7   :  { %1826 = vmatprep.subr.bf16.mxu0 %v1825_v50  ;;  %v1837_v23 = vpack.c.bf16 %v392_v16, %v388_v15  ;;  %v391_v24 = vld [vmem:[#allocation2 + $0x960] sm:$0xff]  ;;  %v396_v28 = vld [vmem:[#allocation2 + $0x988] sm:$0xff]  ;;  %v154_v43 = vld [vmem:[#allocation2 + $0x1f8] sm:$0xff] }
  0xa8   :  { %1956 = vmatpush1.bf16.msra.mxu1 %v1955_v56  ;;  %v400_v29 = vld [vmem:[#allocation2 + $0x9a8] sm:$0xff]  ;;  %v395_v31 = vld [vmem:[#allocation2 + $0x980] sm:$0xff]  ;;  %v1839_v32 = vpack.c.bf16 %v391_v24, %v387_v20  ;;  %v1973_v50 = vpack.c.bf16 %v154_v43, %v150_v42  ;;  %v149_v52 = vld [vmem:[#allocation2 + $0x1d0] sm:$0xff] }
  0xa9   :  { %1958 = vmatprep.subr.bf16.mxu1 %v1957_v58  ;;  %v2675_v38 = vld [vmem:[%s2837_s0 + $0x8] sm:$0xff]  ;;  %v1841_v39 = vpack.c.bf16 %v400_v29, %v396_v28  ;;  %v399_v40 = vld [vmem:[#allocation2 + $0x9a0] sm:$0xff]  ;;  %v153_v53 = vld [vmem:[#allocation2 + $0x1f0] sm:$0xff] }
  0xaa   :  { %1828 = vmatpush1.bf16.msra.mxu0 %v1827_v57  ;;  %v2679_v44 = vrot.slane %v2675_v38, %v2648_v11  ;;  %v404_v45 = vld [vmem:[#allocation2 + $0x9c8] sm:$0xff]  ;;  %v1843_v49 = vpack.c.bf16 %v399_v40, %v395_v31  ;;  %v403_v51 = vld [vmem:[#allocation2 + $0x9c0] sm:$0xff]  ;;  %v158_v56 = vld [vmem:[#allocation2 + $0x218] sm:$0xff]  ;;  %v1975_v60 = vpack.c.bf16 %v153_v53, %v149_v52 }
  0xab   :  { %1830 = vmatprep.subr.bf16.mxu0 %v1829_v63  ;;  %v408_v46 = vld [vmem:[#allocation2 + $0x9e8] sm:$0xff]  ;;  %v407_v55 = vld [vmem:[#allocation2 + $0x9e0] sm:$0xff]  ;;  %v162_v57 = vld [vmem:[#allocation2 + $0x238] sm:$0xff] }
  0xac   :  { %1960 = vmatpush1.bf16.msra.mxu1 %v1959_v33  ;;  %v2683_v48 = vcombine.high %v2679_v44, %v2679_v44  ;;  %v1845_v54 = vpack.c.bf16 %v408_v46, %v404_v45  ;;  %v412_v58 = vld [vmem:[#allocation2 + $0xa08] sm:$0xff]  ;;  %v1847_v62 = vpack.c.bf16 %v407_v55, %v403_v51  ;;  %v1977_v63 = vpack.c.bf16 %v162_v57, %v158_v56  ;;  %v411_v0 = vld [vmem:[#allocation2 + $0xa00] sm:$0xff]  ;;  %v157_v1 = vld [vmem:[#allocation2 + $0x210] sm:$0xff] }
  0xad   :  { %1962 = vmatprep.subr.bf16.mxu1 %v1961_v6  ;;  %v416_v59 = vld [vmem:[#allocation2 + $0xa28] sm:$0xff]  ;;  %v161_v2 = vld [vmem:[#allocation2 + $0x230] sm:$0xff]  ;;  %v415_v4 = vld [vmem:[#allocation2 + $0xa20] sm:$0xff] }
  0xae   :  { %1832 = vmatpush1.bf16.msra.mxu0 %v1831_v5  ;;  %875 = vmatprep.mubr.f32.mxu0 %v2683_v48  ;;  %v1849_v3 = vpack.c.bf16 %v416_v59, %v412_v58  ;;  %v166_v33 = vld [vmem:[#allocation2 + $0x258] sm:$0xff]  ;;  %v420_v6 = vld [vmem:[#allocation2 + $0xa48] sm:$0xff]  ;;  %v1979_v8 = vpack.c.bf16 %v161_v2, %v157_v1  ;;  %v1851_v9 = vpack.c.bf16 %v415_v4, %v411_v0  ;;  %v419_v12 = vld [vmem:[#allocation2 + $0xa40] sm:$0xff] }
  0xaf   :  { %1834 = vmatprep.subr.bf16.mxu0 %v1833_v10  ;;  %v170_v5 = vld [vmem:[#allocation2 + $0x278] sm:$0xff]  ;;  %v424_v7 = vld [vmem:[#allocation2 + $0xa68] sm:$0xff]  ;;  %v165_v13 = vld [vmem:[#allocation2 + $0x250] sm:$0xff] }
  0xb0   :  { %1964 = vmatpush1.bf16.msra.mxu1 %v1963_v17  ;;  %v1981_v10 = vpack.c.bf16 %v170_v5, %v166_v33  ;;  %v169_v14 = vld [vmem:[#allocation2 + $0x270] sm:$0xff]  ;;  %v1853_v15 = vpack.c.bf16 %v424_v7, %v420_v6  ;;  %v423_v16 = vld [vmem:[#allocation2 + $0xa60] sm:$0xff]  ;;  %v174_v17 = vld [vmem:[#allocation2 + $0x298] sm:$0xff] }
  0xb1   :  { %1966 = vmatprep.subr.bf16.mxu1 %v1965_v19  ;;  %v428_v19 = vld [vmem:[#allocation2 + $0xa88] sm:$0xff]  ;;  %v1983_v21 = vpack.c.bf16 %v169_v14, %v165_v13  ;;  %v1855_v22 = vpack.c.bf16 %v423_v16, %v419_v12  ;;  %v427_v24 = vld [vmem:[#allocation2 + $0xa80] sm:$0xff]  ;;  %v173_v26 = vld [vmem:[#allocation2 + $0x290] sm:$0xff] }
  0xb2   :  { %1836 = vmatpush1.bf16.msra.mxu0 %v1835_v18  ;;  %v178_v18 = vld [vmem:[#allocation2 + $0x2b8] sm:$0xff]  ;;  %v432_v20 = vld [vmem:[#allocation2 + $0xaa8] sm:$0xff]  ;;  %v177_v27 = vld [vmem:[#allocation2 + $0x2b0] sm:$0xff] }
  0xb3   :  { %1838 = vmatprep.subr.bf16.mxu0 %v1837_v23  ;;  %v1985_v23 = vpack.c.bf16 %v178_v18, %v174_v17  ;;  %v1857_v28 = vpack.c.bf16 %v432_v20, %v428_v19  ;;  %v431_v29 = vld [vmem:[#allocation2 + $0xaa0] sm:$0xff]  ;;  %v186_v31 = vld [vmem:[#allocation2 + $0x2f8] sm:$0xff]  ;;  %v1987_v36 = vpack.c.bf16 %v177_v27, %v173_v26  ;;  %v181_v42 = vld [vmem:[#allocation2 + $0x2d0] sm:$0xff] }
  0xb4   :  { %1968 = vmatpush1.bf16.msra.mxu1 %v1967_v30  ;;  %v182_v30 = vld [vmem:[#allocation2 + $0x2d8] sm:$0xff]  ;;  %v1859_v37 = vpack.c.bf16 %v431_v29, %v427_v24  ;;  %v435_v40 = vld [vmem:[#allocation2 + $0xac0] sm:$0xff]  ;;  %v185_v43 = vld [vmem:[#allocation2 + $0x2f0] sm:$0xff] }
  0xb5   :  { %1970 = vmatprep.subr.bf16.mxu1 %v1969_v35  ;;  %v440_v35 = vld [vmem:[#allocation2 + $0xae8] sm:$0xff]  ;;  %v439_v46 = vld [vmem:[#allocation2 + $0xae0] sm:$0xff]  ;;  %v1991_v52 = vpack.c.bf16 %v185_v43, %v181_v42  ;;  %v189_v56 = vld [vmem:[#allocation2 + $0x310] sm:$0xff] }
  0xb6   :  { %1840 = vmatpush1.bf16.msra.mxu0 %v1839_v32  ;;  %v436_v32 = vld [vmem:[#allocation2 + $0xac8] sm:$0xff]  ;;  %v1863_v53 = vpack.c.bf16 %v439_v46, %v435_v40  ;;  %v443_v55 = vld [vmem:[#allocation2 + $0xb00] sm:$0xff]  ;;  %v193_v57 = vld [vmem:[#allocation2 + $0x330] sm:$0xff] }
  0xb7   :  { %1842 = vmatprep.subr.bf16.mxu0 %v1841_v39  ;;  %v1989_v39 = vpack.c.bf16 %v186_v31, %v182_v30  ;;  %v1861_v45 = vpack.c.bf16 %v440_v35, %v436_v32  ;;  %v448_v51 = vld [vmem:[#allocation2 + $0xb28] sm:$0xff]  ;;  %v447_v59 = vld [vmem:[#allocation2 + $0xb20] sm:$0xff]  ;;  %v1995_v1 = vpack.c.bf16 %v193_v57, %v189_v56  ;;  %v197_v33 = vld [vmem:[#allocation2 + $0x350] sm:$0xff] }
  0xb8   :  { %1972 = vmatpush1.bf16.msra.mxu1 %v1971_v47  ;;  %v190_v47 = vld [vmem:[#allocation2 + $0x318] sm:$0xff]  ;;  %v456_v0 = vld [vmem:[#allocation2 + $0xb68] sm:$0xff]  ;;  %v1867_v2 = vpack.c.bf16 %v447_v59, %v443_v55  ;;  %v451_v4 = vld [vmem:[#allocation2 + $0xb40] sm:$0xff] }
  0xb9   :  { %1974 = vmatprep.subr.bf16.mxu1 %v1973_v50  ;;  %v444_v50 = vld [vmem:[#allocation2 + $0xb08] sm:$0xff]  ;;  %v201_v5 = vld [vmem:[#allocation2 + $0x370] sm:$0xff]  ;;  %v455_v7 = vld [vmem:[#allocation2 + $0xb60] sm:$0xff] }
  0xba   :  { %1844 = vmatpush1.bf16.msra.mxu0 %v1843_v49  ;;  %v194_v49 = vld [vmem:[#allocation2 + $0x338] sm:$0xff]  ;;  %v1865_v58 = vpack.c.bf16 %v448_v51, %v444_v50  ;;  %v464_v12 = vld [vmem:[#allocation2 + $0xba8] sm:$0xff]  ;;  %v1999_v13 = vpack.c.bf16 %v201_v5, %v197_v33  ;;  %v1871_v14 = vpack.c.bf16 %v455_v7, %v451_v4  ;;  %v459_v16 = vld [vmem:[#allocation2 + $0xb80] sm:$0xff] }
  0xbb   :  { %1846 = vmatprep.subr.bf16.mxu0 %v1845_v54  ;;  %v1993_v54 = vpack.c.bf16 %v194_v49, %v190_v47  ;;  %v205_v17 = vld [vmem:[#allocation2 + $0x390] sm:$0xff]  ;;  %v463_v20 = vld [vmem:[#allocation2 + $0xba0] sm:$0xff]  ;;  %v472_v24 = vld [vmem:[#allocation2 + $0xbe8] sm:$0xff] }
  0xbc   :  { %1976 = vmatpush1.bf16.msra.mxu1 %v1975_v60  ;;  %v198_v60 = vld [vmem:[#allocation2 + $0x358] sm:$0xff]  ;;  %v209_v18 = vld [vmem:[#allocation2 + $0x3b0] sm:$0xff]  ;;  %v1875_v27 = vpack.c.bf16 %v463_v20, %v459_v16  ;;  %v467_v29 = vld [vmem:[#allocation2 + $0xbc0] sm:$0xff] }
  0xbd   :  { %1978 = vmatprep.subr.bf16.mxu1 %v1977_v63  ;;  %v452_v63 = vld [vmem:[#allocation2 + $0xb48] sm:$0xff]  ;;  %v2003_v26 = vpack.c.bf16 %v209_v18, %v205_v17  ;;  %v213_v30 = vld [vmem:[#allocation2 + $0x3d0] sm:$0xff]  ;;  %v471_v35 = vld [vmem:[#allocation2 + $0xbe0] sm:$0xff] }
  0xbe   :  { %1848 = vmatpush1.bf16.msra.mxu0 %v1847_v62  ;;  %v202_v62 = vld [vmem:[#allocation2 + $0x378] sm:$0xff]  ;;  %v1869_v6 = vpack.c.bf16 %v456_v0, %v452_v63  ;;  %v217_v31 = vld [vmem:[#allocation2 + $0x3f0] sm:$0xff]  ;;  %v476_v40 = vld [vmem:[#allocation2 + $0xc08] sm:$0xff] }
  0xbf   :  { %1850 = vmatprep.subr.bf16.mxu0 %v1849_v3  ;;  %v1997_v3 = vpack.c.bf16 %v202_v62, %v198_v60  ;;  %v480_v42 = vld [vmem:[#allocation2 + $0xc28] sm:$0xff]  ;;  %v2007_v43 = vpack.c.bf16 %v217_v31, %v213_v30  ;;  %v475_v47 = vld [vmem:[#allocation2 + $0xc00] sm:$0xff]  ;;  %v221_v49 = vld [vmem:[#allocation2 + $0x410] sm:$0xff] }
  0xc0   :  { %1980 = vmatpush1.bf16.msra.mxu1 %v1979_v8  ;;  %v206_v8 = vld [vmem:[#allocation2 + $0x398] sm:$0xff]  ;;  %v225_v50 = vld [vmem:[#allocation2 + $0x430] sm:$0xff]  ;;  %v1881_v51 = vpack.c.bf16 %v480_v42, %v476_v40  ;;  %v488_v56 = vld [vmem:[#allocation2 + $0xc68] sm:$0xff] }
  0xc1   :  { %1982 = vmatprep.subr.bf16.mxu1 %v1981_v10  ;;  %v460_v10 = vld [vmem:[#allocation2 + $0xb88] sm:$0xff]  ;;  %v2011_v57 = vpack.c.bf16 %v225_v50, %v221_v49  ;;  %v483_v60 = vld [vmem:[#allocation2 + $0xc40] sm:$0xff]  ;;  %v229_v62 = vld [vmem:[#allocation2 + $0x450] sm:$0xff] }
  0xc2   :  { %1852 = vmatpush1.bf16.msra.mxu0 %v1851_v9  ;;  %v210_v9 = vld [vmem:[#allocation2 + $0x3b8] sm:$0xff]  ;;  %v1873_v19 = vpack.c.bf16 %v464_v12, %v460_v10  ;;  %v233_v63 = vld [vmem:[#allocation2 + $0x470] sm:$0xff]  ;;  %v492_v4 = vld [vmem:[#allocation2 + $0xc88] sm:$0xff] }
  0xc3   :  { %1854 = vmatprep.subr.bf16.mxu0 %v1853_v15  ;;  %v2001_v15 = vpack.c.bf16 %v210_v9, %v206_v8  ;;  %v496_v33 = vld [vmem:[#allocation2 + $0xca8] sm:$0xff]  ;;  %v2015_v5 = vpack.c.bf16 %v233_v63, %v229_v62  ;;  %v491_v8 = vld [vmem:[#allocation2 + $0xc80] sm:$0xff]  ;;  %v237_v9 = vld [vmem:[#allocation2 + $0x490] sm:$0xff] }
  0xc4   :  { %1984 = vmatpush1.bf16.msra.mxu1 %v1983_v21  ;;  %v214_v21 = vld [vmem:[#allocation2 + $0x3d8] sm:$0xff]  ;;  %v241_v10 = vld [vmem:[#allocation2 + $0x4b0] sm:$0xff]  ;;  %v1889_v12 = vpack.c.bf16 %v496_v33, %v492_v4  ;;  %v504_v16 = vld [vmem:[#allocation2 + $0xce8] sm:$0xff] }
  0xc5   :  { %1986 = vmatprep.subr.bf16.mxu1 %v1985_v23  ;;  %v468_v23 = vld [vmem:[#allocation2 + $0xbc8] sm:$0xff]  ;;  %v2019_v17 = vpack.c.bf16 %v241_v10, %v237_v9  ;;  %v499_v20 = vld [vmem:[#allocation2 + $0xcc0] sm:$0xff]  ;;  %v262_v40 = vld [vmem:[#allocation2 + $0x558] sm:$0xff] }
  0xc6   :  { %1856 = vmatpush1.bf16.msra.mxu0 %v1855_v22  ;;  %v218_v22 = vld [vmem:[#allocation2 + $0x3f8] sm:$0xff]  ;;  %v1877_v32 = vpack.c.bf16 %v472_v24, %v468_v23  ;;  %v503_v24 = vld [vmem:[#allocation2 + $0xce0] sm:$0xff] }
  0xc7   :  { %1858 = vmatprep.subr.bf16.mxu0 %v1857_v28  ;;  %v2005_v28 = vpack.c.bf16 %v218_v22, %v214_v21  ;;  %v245_v21 = vld [vmem:[#allocation2 + $0x4d0] sm:$0xff]  ;;  %v266_v42 = vld [vmem:[#allocation2 + $0x578] sm:$0xff]  ;;  %v515_v50 = vld [vmem:[#allocation2 + $0xd40] sm:$0xff] }
  0xc8   :  { %1988 = vmatpush1.bf16.msra.mxu1 %v1987_v36  ;;  %v222_v36 = vld [vmem:[#allocation2 + $0x418] sm:$0xff]  ;;  %v249_v22 = vld [vmem:[#allocation2 + $0x4f0] sm:$0xff]  ;;  %v2029_v49 = vpack.c.bf16 %v266_v42, %v262_v40  ;;  %v523_v63 = vld [vmem:[#allocation2 + $0xd80] sm:$0xff] }
  0xc9   :  { %1990 = vmatprep.subr.bf16.mxu1 %v1989_v39  ;;  %v644_v39 = vcombine.high %v2675_v38, %v2675_v38  ;;  %v484_v38 = vld [vmem:[#allocation2 + $0xc48] sm:$0xff]  ;;  %v2023_v30 = vpack.c.bf16 %v249_v22, %v245_v21  ;;  %v278_v4 = vld [vmem:[#allocation2 + $0x5d8] sm:$0xff]  ;;  %v531_v10 = vld [vmem:[#allocation2 + $0xdc0] sm:$0xff] }
  0xca   :  { %1860 = vmatpush1.bf16.msra.mxu0 %v1859_v37  ;;  %v226_v37 = vld [vmem:[#allocation2 + $0x438] sm:$0xff]  ;;  %v1885_v0 = vpack.c.bf16 %v488_v56, %v484_v38  ;;  %v539_v22 = vld [vmem:[#allocation2 + $0xe00] sm:$0xff] }
  0xcb   :  { %1862 = vmatprep.subr.bf16.mxu0 %v1861_v45  ;;  %v1879_v45 = vpack.c.bf16 %v471_v35, %v467_v29  ;;  %v2009_v46 = vpack.c.bf16 %v226_v37, %v222_v36  ;;  %v2689_v55 = vrot.slane %v644_v39, %v2648_v11  ;;  %v512_v29 = vld [vmem:[#allocation2 + $0xd28] sm:$0xff]  ;;  %v253_v35 = vld [vmem:[#allocation2 + $0x510] sm:$0xff]  ;;  %v511_v39 = vld [vmem:[#allocation2 + $0xd20] sm:$0xff] }
  0xcc   :  { %1992 = vmatpush1.bf16.msra.mxu1 %v1991_v52  ;;  %v479_v52 = vld [vmem:[#allocation2 + $0xc20] sm:$0xff]  ;;  %v257_v36 = vld [vmem:[#allocation2 + $0x530] sm:$0xff]  ;;  %v270_v38 = vld [vmem:[#allocation2 + $0x598] sm:$0xff] }
  0xcd   :  { %1994 = vmatprep.subr.bf16.mxu1 %v1993_v54  ;;  %v234_v54 = vld [vmem:[#allocation2 + $0x478] sm:$0xff]  ;;  %v2693_v11 = vcombine.high %v2689_v55, %v2689_v55  ;;  %v551_v42 = vld [vmem:[#allocation2 + $0xe60] sm:$0xff] }
  0xce   :  { %1864 = vmatpush1.bf16.msra.mxu0 %v1863_v53  ;;  %v230_v53 = vld [vmem:[#allocation2 + $0x458] sm:$0xff] }
  0xcf   :  { %1866 = vmatprep.subr.bf16.mxu0 %v1865_v58  ;;  %v1883_v58 = vpack.c.bf16 %v479_v52, %v475_v47  ;;  %v2013_v59 = vpack.c.bf16 %v234_v54, %v230_v53  ;;  %v265_v52 = vld [vmem:[#allocation2 + $0x570] sm:$0xff]  ;;  %v519_v54 = vld [vmem:[#allocation2 + $0xd60] sm:$0xff]  ;;  %v274_v56 = vld [vmem:[#allocation2 + $0x5b8] sm:$0xff] }
  0xd0   :  { %1996 = vmatpush1.bf16.msra.mxu1 %v1995_v1  ;;  %v487_v1 = vld [vmem:[#allocation2 + $0xc60] sm:$0xff]  ;;  %v2033_v62 = vpack.c.bf16 %v274_v56, %v270_v38  ;;  %v282_v33 = vld [vmem:[#allocation2 + $0x5f8] sm:$0xff] }
  0xd1   :  { %1998 = vmatprep.subr.bf16.mxu1 %v1997_v3  ;;  %v242_v3 = vld [vmem:[#allocation2 + $0x4b8] sm:$0xff]  ;;  %v2037_v9 = vpack.c.bf16 %v282_v33, %v278_v4  ;;  %v559_v56 = vld [vmem:[#allocation2 + $0xea0] sm:$0xff] }
  0xd2   :  { %1868 = vmatpush1.bf16.msra.mxu0 %v1867_v2  ;;  %v238_v2 = vld [vmem:[#allocation2 + $0x498] sm:$0xff]  ;;  %v567_v33 = vld [vmem:[#allocation2 + $0xee0] sm:$0xff] }
  0xd3   :  { %1870 = vmatprep.subr.bf16.mxu0 %v1869_v6  ;;  %v1887_v6 = vpack.c.bf16 %v487_v1, %v483_v60  ;;  %v2017_v7 = vpack.c.bf16 %v242_v3, %v238_v2  ;;  %v1903_v60 = vpack.c.bf16 %v519_v54, %v515_v50  ;;  %v273_v1 = vld [vmem:[#allocation2 + $0x5b0] sm:$0xff]  ;;  %v527_v3 = vld [vmem:[#allocation2 + $0xda0] sm:$0xff] }
  0xd4   :  { %2000 = vmatpush1.bf16.msra.mxu1 %v1999_v13  ;;  %v495_v13 = vld [vmem:[#allocation2 + $0xca0] sm:$0xff]  ;;  %v305_v54 = vld [vmem:[#allocation2 + $0x6b0] sm:$0xff] }
  0xd5   :  { %2002 = vmatprep.subr.bf16.mxu1 %v2001_v15  ;;  %v250_v15 = vld [vmem:[#allocation2 + $0x4f8] sm:$0xff]  ;;  %v1891_v18 = vpack.c.bf16 %v495_v13, %v491_v8  ;;  %v1907_v8 = vpack.c.bf16 %v527_v3, %v523_v63  ;;  %v281_v13 = vld [vmem:[#allocation2 + $0x5f0] sm:$0xff] }
  0xd6   :  { %1872 = vmatpush1.bf16.msra.mxu0 %v1871_v14  ;;  %v246_v14 = vld [vmem:[#allocation2 + $0x4d8] sm:$0xff]  ;;  %v313_v3 = vld [vmem:[#allocation2 + $0x6f0] sm:$0xff] }
  0xd7   :  { %1874 = vmatprep.subr.bf16.mxu0 %v1873_v19  ;;  %v2021_v19 = vpack.c.bf16 %v250_v15, %v246_v14  ;;  %v535_v15 = vld [vmem:[#allocation2 + $0xde0] sm:$0xff] }
  0xd8   :  { %2004 = vmatpush1.bf16.msra.mxu1 %v2003_v26  ;;  %v254_v26 = vld [vmem:[#allocation2 + $0x518] sm:$0xff] }
  0xd9   :  { %2006 = vmatprep.subr.bf16.mxu1 %v2005_v28  ;;  %v508_v28 = vld [vmem:[#allocation2 + $0xd08] sm:$0xff] }
  0xda   :  { %1876 = vmatpush1.bf16.msra.mxu0 %v1875_v27  ;;  %v258_v27 = vld [vmem:[#allocation2 + $0x538] sm:$0xff]  ;;  %v1897_v37 = vpack.c.bf16 %v512_v29, %v508_v28 }
  0xdb   :  { %1878 = vmatprep.subr.bf16.mxu0 %v1877_v32  ;;  %v2025_v31 = vpack.c.bf16 %v258_v27, %v254_v26  ;;  %v507_v32 = vld [vmem:[#allocation2 + $0xd00] sm:$0xff]  ;;  %v294_v28 = vld [vmem:[#allocation2 + $0x658] sm:$0xff] }
  0xdc   :  { %2008 = vmatpush1.bf16.msra.mxu1 %v2007_v43  ;;  %v516_v43 = vld [vmem:[#allocation2 + $0xd48] sm:$0xff]  ;;  %v1899_v47 = vpack.c.bf16 %v511_v39, %v507_v32  ;;  %v543_v27 = vld [vmem:[#allocation2 + $0xe20] sm:$0xff]  ;;  %v298_v29 = vld [vmem:[#allocation2 + $0x678] sm:$0xff] }
  0xdd   :  { %2010 = vmatprep.subr.bf16.mxu1 %v2009_v46  ;;  %v2027_v46 = vpack.c.bf16 %v257_v36, %v253_v35  ;;  %v1915_v32 = vpack.c.bf16 %v543_v27, %v539_v22  ;;  %v2045_v35 = vpack.c.bf16 %v298_v29, %v294_v28  ;;  %v547_v36 = vld [vmem:[#allocation2 + $0xe40] sm:$0xff]  ;;  %v297_v39 = vld [vmem:[#allocation2 + $0x670] sm:$0xff] }
  0xde   :  { %1880 = vmatpush1.bf16.msra.mxu0 %v1879_v45  ;;  %v520_v45 = vld [vmem:[#allocation2 + $0xd68] sm:$0xff]  ;;  %v1919_v50 = vpack.c.bf16 %v551_v42, %v547_v36  ;;  %v329_v27 = vld [vmem:[#allocation2 + $0x770] sm:$0xff]  ;;  %v583_v29 = vld [vmem:[#allocation2 + $0xf60] sm:$0xff] }
  0xdf   :  { %1882 = vmatprep.subr.bf16.mxu0 %v1881_v51  ;;  %1018 = vmatmul.mubr.f32.vlgmr.msra.gmra.mrb[2].mxu1 %v2654_v25  ;;  %v500_v25 = vld [vmem:[#allocation2 + $0xcc8] sm:$0xff]  ;;  %v261_v51 = vld [vmem:[#allocation2 + $0x550] sm:$0xff]  ;;  %v1901_v53 = vpack.c.bf16 %v520_v45, %v516_v43  ;;  %v302_v43 = vld [vmem:[#allocation2 + $0x698] sm:$0xff] }
  0xe0   :  { %2012 = vmatpush1.bf16.msra.mxu1 %v2011_v57  ;;  %1088 = vmatprep.mubr.f32.mxu1 %v2666_v41  ;;  %v1893_v23 = vpack.c.bf16 %v504_v16, %v500_v25  ;;  %v1895_v41 = vpack.c.bf16 %v503_v24, %v499_v20  ;;  %v524_v57 = vld [vmem:[#allocation2 + $0xd88] sm:$0xff]  ;;  %v286_v25 = vld [vmem:[#allocation2 + $0x618] sm:$0xff]  ;;  %v1911_v20 = vpack.c.bf16 %v535_v15, %v531_v10  ;;  %v289_v24 = vld [vmem:[#allocation2 + $0x630] sm:$0xff] }
  0xe1   :  { %876 = vmatmul.mubr.f32.vlgmr.msra.gmra.mrb[0].mxu0 %v2679_v44  ;;  %2014 = vmatprep.subr.bf16.mxu1 %v2013_v59  ;;  %v2031_v59 = vpack.c.bf16 %v265_v52, %v261_v51  ;;  %v290_v16 = vld [vmem:[#allocation2 + $0x638] sm:$0xff]  ;;  %v555_v52 = vld [vmem:[#allocation2 + $0xe80] sm:$0xff]  ;;  %v321_v15 = vld [vmem:[#allocation2 + $0x730] sm:$0xff] }
  0xe2   :  { %1884 = vmatpush1.bf16.msra.mxu0 %v1883_v58  ;;  %946 = vmatprep.mubr.f32.mxu0 %v2693_v11  ;;  %v528_v58 = vld [vmem:[#allocation2 + $0xda8] sm:$0xff]  ;;  %v2041_v21 = vpack.c.bf16 %v290_v16, %v286_v25  ;;  %v306_v45 = vld [vmem:[#allocation2 + $0x6b8] sm:$0xff]  ;;  %v1923_v63 = vpack.c.bf16 %v559_v56, %v555_v52  ;;  %v575_v16 = vld [vmem:[#allocation2 + $0xf20] sm:$0xff] }
  0xe3   :  { %1886 = vmatprep.subr.bf16.mxu0 %v1885_v0  ;;  %v269_v0 = vld [vmem:[#allocation2 + $0x590] sm:$0xff]  ;;  %v1905_v2 = vpack.c.bf16 %v528_v58, %v524_v57  ;;  %v2049_v51 = vpack.c.bf16 %v306_v45, %v302_v43  ;;  %v310_v57 = vld [vmem:[#allocation2 + $0x6d8] sm:$0xff]  ;;  %v591_v45 = vld [vmem:[#allocation2 + $0xfa0] sm:$0xff] }
  0xe4   :  { %2016 = vmatpush1.bf16.msra.mxu1 %v2015_v5  ;;  %v532_v5 = vld [vmem:[#allocation2 + $0xdc8] sm:$0xff]  ;;  %v314_v58 = vld [vmem:[#allocation2 + $0x6f8] sm:$0xff]  ;;  %v337_v42 = vld [vmem:[#allocation2 + $0x7b0] sm:$0xff] }
  0xe5   :  { %2018 = vmatprep.subr.bf16.mxu1 %v2017_v7  ;;  %v2035_v7 = vpack.c.bf16 %v273_v1, %v269_v0  ;;  %v2053_v0 = vpack.c.bf16 %v314_v58, %v310_v57  ;;  %v563_v1 = vld [vmem:[#allocation2 + $0xec0] sm:$0xff]  ;;  %v345_v56 = vld [vmem:[#allocation2 + $0x7f0] sm:$0xff] }
  0xe6   :  { %1888 = vmatpush1.bf16.msra.mxu0 %v1887_v6  ;;  %v536_v6 = vld [vmem:[#allocation2 + $0xde8] sm:$0xff]  ;;  %v1927_v10 = vpack.c.bf16 %v567_v33, %v563_v1  ;;  %v599_v58 = vld [vmem:[#allocation2 + $0xfe0] sm:$0xff]  ;;  %v349_v1 = vld [vmem:[#allocation2 + $0x810] sm:$0xff] }
  0xe7   :  { %1890 = vmatprep.subr.bf16.mxu0 %v1889_v12  ;;  %v277_v12 = vld [vmem:[#allocation2 + $0x5d0] sm:$0xff]  ;;  %v1909_v14 = vpack.c.bf16 %v536_v6, %v532_v5  ;;  %v318_v5 = vld [vmem:[#allocation2 + $0x718] sm:$0xff] }
  0xe8   :  { %2020 = vmatpush1.bf16.msra.mxu1 %v2019_v17  ;;  %v540_v17 = vld [vmem:[#allocation2 + $0xe08] sm:$0xff]  ;;  %v322_v6 = vld [vmem:[#allocation2 + $0x738] sm:$0xff] }
  0xe9   :  { %2022 = vmatprep.subr.bf16.mxu1 %v2021_v19  ;;  %v2039_v19 = vpack.c.bf16 %v281_v13, %v277_v12  ;;  %v2057_v12 = vpack.c.bf16 %v322_v6, %v318_v5  ;;  %v571_v13 = vld [vmem:[#allocation2 + $0xf00] sm:$0xff]  ;;  %v357_v6 = vld [vmem:[#allocation2 + $0x850] sm:$0xff] }
  0xea   :  { %1892 = vmatpush1.bf16.msra.mxu0 %v1891_v18  ;;  %v544_v18 = vld [vmem:[#allocation2 + $0xe28] sm:$0xff]  ;;  %v1931_v22 = vpack.c.bf16 %v575_v16, %v571_v13 }
  0xeb   :  { %1894 = vmatprep.subr.bf16.mxu0 %v1893_v23  ;;  %v285_v23 = vld [vmem:[#allocation2 + $0x610] sm:$0xff]  ;;  %v1913_v26 = vpack.c.bf16 %v544_v18, %v540_v17  ;;  %v326_v17 = vld [vmem:[#allocation2 + $0x758] sm:$0xff]  ;;  %v1242_v13 = vld [vmem:[#allocation5 + $0x8] sm:$0xff] }
  0xec   :  { %2024 = vmatpush1.bf16.msra.mxu1 %v2023_v30  ;;  %v548_v30 = vld [vmem:[#allocation2 + $0xe48] sm:$0xff]  ;;  %v330_v18 = vld [vmem:[#allocation2 + $0x778] sm:$0xff] }
  0xed   :  { %2026 = vmatprep.subr.bf16.mxu1 %v2025_v31  ;;  %v2043_v31 = vpack.c.bf16 %v289_v24, %v285_v23  ;;  %v2061_v23 = vpack.c.bf16 %v330_v18, %v326_v17  ;;  %v579_v24 = vld [vmem:[#allocation2 + $0xf40] sm:$0xff]  ;;  %v1243_v17 = vld [vmem:[#allocation5 + $0x10] sm:$0xff]  ;;  %v1246_v18 = vld [vmem:[#allocation5 + $0x28] sm:$0xff] }
  0xee   :  { %1896 = vmatpush1.bf16.msra.mxu0 %v1895_v41  ;;  %v552_v41 = vld [vmem:[#allocation2 + $0xe68] sm:$0xff]  ;;  %v1935_v36 = vpack.c.bf16 %v583_v29, %v579_v24 }
  0xef   :  { %1898 = vmatprep.subr.bf16.mxu0 %v1897_v37  ;;  %v293_v37 = vld [vmem:[#allocation2 + $0x650] sm:$0xff]  ;;  %v1917_v40 = vpack.c.bf16 %v552_v41, %v548_v30  ;;  %v334_v30 = vld [vmem:[#allocation2 + $0x798] sm:$0xff]  ;;  %v1250_v24 = vld [vmem:[#allocation5 + $0x48] sm:$0xff] }
  0xf0   :  { %2028 = vmatpush1.bf16.msra.mxu1 %v2027_v46  ;;  %v556_v46 = vld [vmem:[#allocation2 + $0xe88] sm:$0xff]  ;;  %v338_v41 = vld [vmem:[#allocation2 + $0x7b8] sm:$0xff] }
  0xf1   :  { %2030 = vmatprep.subr.bf16.mxu1 %v2029_v49  ;;  %v2047_v49 = vpack.c.bf16 %v297_v39, %v293_v37  ;;  %v2065_v37 = vpack.c.bf16 %v338_v41, %v334_v30  ;;  %v587_v39 = vld [vmem:[#allocation2 + $0xf80] sm:$0xff]  ;;  %v373_v41 = vld [vmem:[#allocation2 + $0x8d0] sm:$0xff] }
  0xf2   :  { %1900 = vmatpush1.bf16.msra.mxu0 %v1899_v47  ;;  %v560_v47 = vld [vmem:[#allocation2 + $0xea8] sm:$0xff]  ;;  %v1939_v52 = vpack.c.bf16 %v591_v45, %v587_v39  ;;  %v1256_v39 = vld [vmem:[#allocation5 + $0x78] sm:$0xff] }
  0xf3   :  { %1902 = vmatprep.subr.bf16.mxu0 %v1901_v53  ;;  %v301_v53 = vld [vmem:[#allocation2 + $0x690] sm:$0xff]  ;;  %v1921_v38 = vpack.c.bf16 %v560_v47, %v556_v46  ;;  %v342_v46 = vld [vmem:[#allocation2 + $0x7d8] sm:$0xff] }
  0xf4   :  { %2032 = vmatpush1.bf16.msra.mxu1 %v2031_v59  ;;  %v564_v59 = vld [vmem:[#allocation2 + $0xec8] sm:$0xff]  ;;  %v346_v47 = vld [vmem:[#allocation2 + $0x7f8] sm:$0xff] }
  0xf5   :  { %2034 = vmatprep.subr.bf16.mxu1 %v2033_v62  ;;  %v2051_v62 = vpack.c.bf16 %v305_v54, %v301_v53  ;;  %v2069_v53 = vpack.c.bf16 %v346_v47, %v342_v46  ;;  %v595_v54 = vld [vmem:[#allocation2 + $0xfc0] sm:$0xff]  ;;  %v381_v46 = vld [vmem:[#allocation2 + $0x910] sm:$0xff] }
  0xf6   :  { %1904 = vmatpush1.bf16.msra.mxu0 %v1903_v60  ;;  %v568_v60 = vld [vmem:[#allocation2 + $0xee8] sm:$0xff] }
  0xf7   :  { %1906 = vmatprep.subr.bf16.mxu0 %v1905_v2  ;;  %v309_v2 = vld [vmem:[#allocation2 + $0x6d0] sm:$0xff]  ;;  %v1925_v4 = vpack.c.bf16 %v568_v60, %v564_v59  ;;  %v350_v59 = vld [vmem:[#allocation2 + $0x818] sm:$0xff] }
  0xf8   :  { %2036 = vmatpush1.bf16.msra.mxu1 %v2035_v7  ;;  %v572_v7 = vld [vmem:[#allocation2 + $0xf08] sm:$0xff]  ;;  %v354_v60 = vld [vmem:[#allocation2 + $0x838] sm:$0xff] }
  0xf9   :  { %2038 = vmatprep.subr.bf16.mxu1 %v2037_v9  ;;  %v2055_v9 = vpack.c.bf16 %v313_v3, %v309_v2  ;;  %v353_v2 = vld [vmem:[#allocation2 + $0x830] sm:$0xff]  ;;  %v358_v3 = vld [vmem:[#allocation2 + $0x858] sm:$0xff] }
  0xfa   :  { %1908 = vmatpush1.bf16.msra.mxu0 %v1907_v8  ;;  %v576_v8 = vld [vmem:[#allocation2 + $0xf28] sm:$0xff]  ;;  %v2075_v33 = vpack.c.bf16 %v353_v2, %v349_v1  ;;  %v393_v1 = vld [vmem:[#allocation2 + $0x970] sm:$0xff] }
  0xfb   :  { %1910 = vmatprep.subr.bf16.mxu0 %v1909_v14  ;;  %v317_v14 = vld [vmem:[#allocation2 + $0x710] sm:$0xff]  ;;  %v1929_v25 = vpack.c.bf16 %v576_v8, %v572_v7  ;;  %v366_v8 = vld [vmem:[#allocation2 + $0x898] sm:$0xff]  ;;  %v1262_v2 = vld [vmem:[#allocation5 + $0xa8] sm:$0xff] }
  0xfc   :  { %2040 = vmatpush1.bf16.msra.mxu1 %v2039_v19  ;;  %v580_v19 = vld [vmem:[#allocation2 + $0xf48] sm:$0xff]  ;;  %v361_v7 = vld [vmem:[#allocation2 + $0x870] sm:$0xff] }
  0xfd   :  { %2042 = vmatprep.subr.bf16.mxu1 %v2041_v21  ;;  %v2059_v21 = vpack.c.bf16 %v321_v15, %v317_v14  ;;  %v1244_v14 = vld [vmem:[#allocation5 + $0x18] sm:$0xff]  ;;  %v1241_v15 = vld [vmem:[#allocation5] sm:$0xff] }
  0xfe   :  { %1912 = vmatpush1.bf16.msra.mxu0 %v1911_v20  ;;  %v584_v20 = vld [vmem:[#allocation2 + $0xf68] sm:$0xff]  ;;  %v2201_v16 = vpack.c.bf16 %v1244_v14, %v1242_v13  ;;  %v401_v13 = vld [vmem:[#allocation2 + $0x9b0] sm:$0xff] }
  0xff   :  { %1914 = vmatprep.subr.bf16.mxu0 %v1913_v26  ;;  %v325_v26 = vld [vmem:[#allocation2 + $0x750] sm:$0xff]  ;;  %v1933_v28 = vpack.c.bf16 %v584_v20, %v580_v19  ;;  %v1248_v19 = vld [vmem:[#allocation5 + $0x38] sm:$0xff]  ;;  %v1266_v14 = vld [vmem:[#allocation5 + $0xc8] sm:$0xff] }
 0x100   :  { %2044 = vmatpush1.bf16.msra.mxu1 %v2043_v31  ;;  %v588_v31 = vld [vmem:[#allocation2 + $0xf88] sm:$0xff] }
 0x101   :  { %2046 = vmatprep.subr.bf16.mxu1 %v2045_v35  ;;  %v2063_v35 = vpack.c.bf16 %v329_v27, %v325_v26  ;;  %v374_v26 = vld [vmem:[#allocation2 + $0x8d8] sm:$0xff] }
 0x102   :  { %1916 = vmatpush1.bf16.msra.mxu0 %v1915_v32  ;;  %v592_v32 = vld [vmem:[#allocation2 + $0xfa8] sm:$0xff]  ;;  %v378_v27 = vld [vmem:[#allocation2 + $0x8f8] sm:$0xff] }
 0x103   :  { %1918 = vmatprep.subr.bf16.mxu0 %v1917_v40  ;;  %v333_v40 = vld [vmem:[#allocation2 + $0x790] sm:$0xff]  ;;  %v1937_v43 = vpack.c.bf16 %v592_v32, %v588_v31  ;;  %v1249_v32 = vld [vmem:[#allocation5 + $0x40] sm:$0xff] }
 0x104   :  { %2048 = vmatpush1.bf16.msra.mxu1 %v2047_v49  ;;  %v596_v49 = vld [vmem:[#allocation2 + $0xfc8] sm:$0xff] }
 0x105   :  { %2050 = vmatprep.subr.bf16.mxu1 %v2049_v51  ;;  %v2067_v51 = vpack.c.bf16 %v337_v42, %v333_v40  ;;  %v382_v40 = vld [vmem:[#allocation2 + $0x918] sm:$0xff] }
 0x106   :  { %1920 = vmatpush1.bf16.msra.mxu0 %v1919_v50  ;;  %v600_v50 = vld [vmem:[#allocation2 + $0xfe8] sm:$0xff]  ;;  %v386_v42 = vld [vmem:[#allocation2 + $0x938] sm:$0xff] }
 0x107   :  { %1922 = vmatprep.subr.bf16.mxu0 %v1921_v38  ;;  %v341_v38 = vld [vmem:[#allocation2 + $0x7d0] sm:$0xff]  ;;  %v1941_v57 = vpack.c.bf16 %v600_v50, %v596_v49  ;;  %v1253_v49 = vld [vmem:[#allocation5 + $0x60] sm:$0xff] }
 0x108   :  { %2052 = vmatpush1.bf16.msra.mxu1 %v2051_v62  ;;  %v2071_v62 = vpack.c.bf16 %v345_v56, %v341_v38  ;;  %v1255_v50 = vld [vmem:[#allocation5 + $0x70] sm:$0xff]  ;;  %v390_v38 = vld [vmem:[#allocation2 + $0x958] sm:$0xff] }
 0x109   :  { %2054 = vmatprep.subr.bf16.mxu1 %v2053_v0  ;;  %v2073_v0 = vpack.c.bf16 %v354_v60, %v350_v59  ;;  %v394_v56 = vld [vmem:[#allocation2 + $0x978] sm:$0xff]  ;;  %v389_v59 = vld [vmem:[#allocation2 + $0x950] sm:$0xff] }
 0x10a   :  { %1924 = vmatpush1.bf16.msra.mxu0 %v1923_v63  ;;  %v1943_v63 = vpack.c.bf16 %v599_v58, %v595_v54  ;;  %v1260_v54 = vld [vmem:[#allocation5 + $0x98] sm:$0xff] }
 0x10b   :  { %1926 = vmatprep.subr.bf16.mxu0 %v1925_v4  ;;  %v362_v4 = vld [vmem:[#allocation2 + $0x878] sm:$0xff] }
 0x10c   :  { %2056 = vmatpush1.bf16.msra.mxu1 %v2055_v9  ;;  %v2077_v5 = vpack.c.bf16 %v362_v4, %v358_v3  ;;  %v370_v9 = vld [vmem:[#allocation2 + $0x8b8] sm:$0xff] }
 0x10d   :  { %2058 = vmatprep.subr.bf16.mxu1 %v2057_v12  ;;  %v369_v12 = vld [vmem:[#allocation2 + $0x8b0] sm:$0xff]  ;;  %v2081_v20 = vpack.c.bf16 %v370_v9, %v366_v8  ;;  %v1264_v3 = vld [vmem:[#allocation5 + $0xb8] sm:$0xff]  ;;  %v1261_v9 = vld [vmem:[#allocation5 + $0xa0] sm:$0xff] }
 0x10e   :  { %1928 = vmatpush1.bf16.msra.mxu0 %v1927_v10  ;;  %v365_v10 = vld [vmem:[#allocation2 + $0x890] sm:$0xff]  ;;  %v398_v4 = vld [vmem:[#allocation2 + $0x998] sm:$0xff]  ;;  %v2221_v8 = vpack.c.bf16 %v1264_v3, %v1262_v2  ;;  %v1282_v2 = vld [vmem:[#allocation5 + $0x148] sm:$0xff] }
 0x10f   :  { %1930 = vmatprep.subr.bf16.mxu0 %v1929_v25  ;;  %v2079_v25 = vpack.c.bf16 %v361_v7, %v357_v6  ;;  %v2083_v30 = vpack.c.bf16 %v369_v12, %v365_v10  ;;  %v2095_v6 = vpack.c.bf16 %v393_v1, %v389_v59  ;;  %v397_v7 = vld [vmem:[#allocation2 + $0x990] sm:$0xff]  ;;  %v1284_v3 = vld [vmem:[#allocation5 + $0x158] sm:$0xff] }
 0x110   :  { %2060 = vmatpush1.bf16.msra.mxu1 %v2059_v21  ;;  %v2203_v21 = vpack.c.bf16 %v1243_v17, %v1241_v15  ;;  %v1263_v10 = vld [vmem:[#allocation5 + $0xb0] sm:$0xff]  ;;  %v1268_v15 = vld [vmem:[#allocation5 + $0xd8] sm:$0xff] }
 0x111   :  { %2062 = vmatprep.subr.bf16.mxu1 %v2061_v23  ;;  %v1247_v23 = vld [vmem:[#allocation5 + $0x30] sm:$0xff]  ;;  %v2223_v17 = vpack.c.bf16 %v1263_v10, %v1261_v9  ;;  %v1281_v9 = vld [vmem:[#allocation5 + $0x140] sm:$0xff] }
 0x112   :  { %1932 = vmatpush1.bf16.msra.mxu0 %v1931_v22  ;;  %v2205_v22 = vpack.c.bf16 %v1248_v19, %v1246_v18  ;;  %v2099_v18 = vpack.c.bf16 %v401_v13, %v397_v7  ;;  %v405_v19 = vld [vmem:[#allocation2 + $0x9d0] sm:$0xff] }
 0x113   :  { %1934 = vmatprep.subr.bf16.mxu0 %v1933_v28  ;;  %v1252_v28 = vld [vmem:[#allocation5 + $0x58] sm:$0xff]  ;;  %v429_v59 = vld [vmem:[#allocation2 + $0xa90] sm:$0xff] }
 0x114   :  { %2064 = vmatpush1.bf16.msra.mxu1 %v2063_v35  ;;  %v2209_v31 = vpack.c.bf16 %v1252_v28, %v1250_v24  ;;  %v1251_v35 = vld [vmem:[#allocation5 + $0x50] sm:$0xff]  ;;  %v1270_v24 = vld [vmem:[#allocation5 + $0xe8] sm:$0xff]  ;;  %v418_v28 = vld [vmem:[#allocation2 + $0xa38] sm:$0xff] }
 0x115   :  { %2066 = vmatprep.subr.bf16.mxu1 %v2065_v37  ;;  %v1254_v37 = vld [vmem:[#allocation5 + $0x68] sm:$0xff]  ;;  %v433_v1 = vld [vmem:[#allocation2 + $0xab0] sm:$0xff] }
 0x116   :  { %1936 = vmatpush1.bf16.msra.mxu0 %v1935_v36  ;;  %v377_v36 = vld [vmem:[#allocation2 + $0x8f0] sm:$0xff]  ;;  %v2213_v47 = vpack.c.bf16 %v1256_v39, %v1254_v37  ;;  %v1274_v37 = vld [vmem:[#allocation5 + $0x108] sm:$0xff]  ;;  %v1276_v39 = vld [vmem:[#allocation5 + $0x118] sm:$0xff] }
 0x117   :  { %1938 = vmatprep.subr.bf16.mxu0 %v1937_v43  ;;  %v2211_v43 = vpack.c.bf16 %v1251_v35, %v1249_v32  ;;  %v2087_v45 = vpack.c.bf16 %v377_v36, %v373_v41  ;;  %v413_v41 = vld [vmem:[#allocation2 + $0xa10] sm:$0xff]  ;;  %v1269_v32 = vld [vmem:[#allocation5 + $0xe0] sm:$0xff] }
 0x118   :  { %2068 = vmatpush1.bf16.msra.mxu1 %v2067_v51  ;;  %v2089_v51 = vpack.c.bf16 %v386_v42, %v382_v40  ;;  %v1271_v35 = vld [vmem:[#allocation5 + $0xf0] sm:$0xff]  ;;  %v422_v40 = vld [vmem:[#allocation2 + $0xa58] sm:$0xff] }
 0x119   :  { %2070 = vmatprep.subr.bf16.mxu1 %v2069_v53  ;;  %v1258_v53 = vld [vmem:[#allocation5 + $0x88] sm:$0xff]  ;;  %v417_v36 = vld [vmem:[#allocation2 + $0xa30] sm:$0xff]  ;;  %v426_v42 = vld [vmem:[#allocation2 + $0xa78] sm:$0xff] }
 0x11a   :  { %1940 = vmatpush1.bf16.msra.mxu0 %v1939_v52  ;;  %v385_v52 = vld [vmem:[#allocation2 + $0x930] sm:$0xff]  ;;  %v2217_v60 = vpack.c.bf16 %v1260_v54, %v1258_v53  ;;  %v1278_v53 = vld [vmem:[#allocation5 + $0x128] sm:$0xff]  ;;  %v1280_v54 = vld [vmem:[#allocation5 + $0x138] sm:$0xff] }
 0x11b   :  { %1942 = vmatprep.subr.bf16.mxu0 %v1941_v57  ;;  %v2215_v57 = vpack.c.bf16 %v1255_v50, %v1253_v49  ;;  %v2091_v58 = vpack.c.bf16 %v385_v52, %v381_v46  ;;  %v421_v46 = vld [vmem:[#allocation2 + $0xa50] sm:$0xff]  ;;  %v1273_v49 = vld [vmem:[#allocation5 + $0x100] sm:$0xff] }
 0x11c   :  { %2072 = vmatpush1.bf16.msra.mxu1 %v2071_v62  ;;  %v1257_v62 = vld [vmem:[#allocation5 + $0x80] sm:$0xff]  ;;  %v1275_v50 = vld [vmem:[#allocation5 + $0x110] sm:$0xff] }
 0x11d   :  { %2074 = vmatprep.subr.bf16.mxu1 %v2073_v0  ;;  %v2093_v0 = vpack.c.bf16 %v394_v56, %v390_v38  ;;  %v425_v52 = vld [vmem:[#allocation2 + $0xa70] sm:$0xff]  ;;  %v430_v38 = vld [vmem:[#allocation2 + $0xa98] sm:$0xff] }
 0x11e   :  { %1944 = vmatpush1.bf16.msra.mxu0 %v1943_v63  ;;  %v1259_v63 = vld [vmem:[#allocation5 + $0x90] sm:$0xff]  ;;  %v434_v56 = vld [vmem:[#allocation2 + $0xab8] sm:$0xff] }
 0x11f   :  { %1089 = vmatmul.mubr.f32.vlgmr.msra.gmra.mrb[2].mxu1 %v2661_v34  ;;  %v1245_v34 = vld [vmem:[#allocation5 + $0x20] sm:$0xff]  ;;  %2202 = vmatprep.subr.bf16.mxu0 %v2201_v16  ;;  %v410_v16 = vld [vmem:[#allocation2 + $0x9f8] sm:$0xff]  ;;  %v437_v7 = vld [vmem:[#allocation2 + $0xad0] sm:$0xff] }
 0x120   :  { %2076 = vmatpush1.bf16.msra.mxu1 %v2075_v33  ;;  %1159 = vmatprep.mubr.f32.mxu1 %v2683_v48  ;;  %v2207_v29 = vpack.c.bf16 %v1247_v23, %v1245_v34  ;;  %v2085_v48 = vpack.c.bf16 %v378_v27, %v374_v26  ;;  %v402_v33 = vld [vmem:[#allocation2 + $0x9b8] sm:$0xff]  ;;  %v409_v23 = vld [vmem:[#allocation2 + $0x9f0] sm:$0xff] }
 0x121   :  { %947 = vmatmul.mubr.f32.vlgmr.msra.gmra.mrb[0].mxu0 %v2689_v55  ;;  %2078 = vmatprep.subr.bf16.mxu1 %v2077_v5  ;;  %v2219_v5 = vpack.c.bf16 %v1259_v63, %v1257_v62  ;;  %v2097_v12 = vpack.c.bf16 %v402_v33, %v398_v4  ;;  %v1272_v26 = vld [vmem:[#allocation5 + $0xf8] sm:$0xff]  ;;  %v1277_v62 = vld [vmem:[#allocation5 + $0x120] sm:$0xff]  ;;  %v1279_v63 = vld [vmem:[#allocation5 + $0x130] sm:$0xff] }
 0x122   :  { %2204 = vmatpush1.bf16.msra.mxu0 %v2203_v21  ;;  %v1265_v21 = vld [vmem:[#allocation5 + $0xc0] sm:$0xff]  ;;  %v414_v27 = vld [vmem:[#allocation2 + $0xa18] sm:$0xff]  ;;  %v1283_v10 = vld [vmem:[#allocation5 + $0x150] sm:$0xff] }
 0x123   :  { %2206 = vmatprep.subr.bf16.mxu0 %v2205_v22  ;;  %v1267_v22 = vld [vmem:[#allocation5 + $0xd0] sm:$0xff]  ;;  %v438_v4 = vld [vmem:[#allocation2 + $0xad8] sm:$0xff] }
 0x124   :  { %2080 = vmatpush1.bf16.msra.mxu1 %v2079_v25  ;;  %v406_v25 = vld [vmem:[#allocation2 + $0x9d8] sm:$0xff]  ;;  %v441_v13 = vld [vmem:[#allocation2 + $0xaf0] sm:$0xff] }
 0x125   :  { %2082 = vmatprep.subr.bf16.mxu1 %v2081_v20  ;;  %v2225_v20 = vpack.c.bf16 %v1268_v15, %v1266_v14  ;;  %v2101_v34 = vpack.c.bf16 %v410_v16, %v406_v25  ;;  %v442_v33 = vld [vmem:[#allocation2 + $0xaf8] sm:$0xff]  ;;  %v1286_v14 = vld [vmem:[#allocation5 + $0x168] sm:$0xff] }
 0x126   :  { %2208 = vmatpush1.bf16.msra.mxu0 %v2207_v29  ;;  %v2227_v29 = vpack.c.bf16 %v1267_v22, %v1265_v21  ;;  %v1288_v15 = vld [vmem:[#allocation5 + $0x178] sm:$0xff]  ;;  %v1285_v21 = vld [vmem:[#allocation5 + $0x160] sm:$0xff]  ;;  %v1287_v22 = vld [vmem:[#allocation5 + $0x170] sm:$0xff] }
 0x127   :  { %2210 = vmatprep.subr.bf16.mxu0 %v2209_v31  ;;  %v2229_v31 = vpack.c.bf16 %v1272_v26, %v1270_v24  ;;  %v446_v25 = vld [vmem:[#allocation2 + $0xb18] sm:$0xff]  ;;  %v1290_v24 = vld [vmem:[#allocation5 + $0x188] sm:$0xff] }
 0x128   :  { %2084 = vmatpush1.bf16.msra.mxu1 %v2083_v30  ;;  %v2103_v30 = vpack.c.bf16 %v409_v23, %v405_v19  ;;  %v450_v16 = vld [vmem:[#allocation2 + $0xb38] sm:$0xff]  ;;  %v445_v19 = vld [vmem:[#allocation2 + $0xb10] sm:$0xff] }
 0x129   :  { %2086 = vmatprep.subr.bf16.mxu1 %v2085_v48  ;;  %v2105_v48 = vpack.c.bf16 %v418_v28, %v414_v27  ;;  %v449_v23 = vld [vmem:[#allocation2 + $0xb30] sm:$0xff]  ;;  %v1292_v26 = vld [vmem:[#allocation5 + $0x198] sm:$0xff] }
 0x12a   :  { %2212 = vmatpush1.bf16.msra.mxu0 %v2211_v43  ;;  %v2231_v43 = vpack.c.bf16 %v1271_v35, %v1269_v32  ;;  %v454_v27 = vld [vmem:[#allocation2 + $0xb58] sm:$0xff]  ;;  %v1289_v32 = vld [vmem:[#allocation5 + $0x180] sm:$0xff]  ;;  %v1291_v35 = vld [vmem:[#allocation5 + $0x190] sm:$0xff] }
 0x12b   :  { %2214 = vmatprep.subr.bf16.mxu0 %v2213_v47  ;;  %v2233_v47 = vpack.c.bf16 %v1276_v39, %v1274_v37  ;;  %v458_v28 = vld [vmem:[#allocation2 + $0xb78] sm:$0xff]  ;;  %v1294_v37 = vld [vmem:[#allocation5 + $0x1a8] sm:$0xff] }
 0x12c   :  { %2088 = vmatpush1.bf16.msra.mxu1 %v2087_v45  ;;  %v2107_v45 = vpack.c.bf16 %v417_v36, %v413_v41  ;;  %v453_v41 = vld [vmem:[#allocation2 + $0xb50] sm:$0xff]  ;;  %v1296_v39 = vld [vmem:[#allocation5 + $0x1b8] sm:$0xff] }
 0x12d   :  { %2090 = vmatprep.subr.bf16.mxu1 %v2089_v51  ;;  %v2109_v51 = vpack.c.bf16 %v426_v42, %v422_v40  ;;  %v457_v36 = vld [vmem:[#allocation2 + $0xb70] sm:$0xff]  ;;  %v462_v40 = vld [vmem:[#allocation2 + $0xb98] sm:$0xff] }
 0x12e   :  { %2216 = vmatpush1.bf16.msra.mxu0 %v2215_v57  ;;  %v2235_v57 = vpack.c.bf16 %v1275_v50, %v1273_v49  ;;  %v466_v42 = vld [vmem:[#allocation2 + $0xbb8] sm:$0xff]  ;;  %v1293_v49 = vld [vmem:[#allocation5 + $0x1a0] sm:$0xff]  ;;  %v1295_v50 = vld [vmem:[#allocation5 + $0x1b0] sm:$0xff] }
 0x12f   :  { %2218 = vmatprep.subr.bf16.mxu0 %v2217_v60  ;;  %v2237_v60 = vpack.c.bf16 %v1280_v54, %v1278_v53  ;;  %v1298_v53 = vld [vmem:[#allocation5 + $0x1c8] sm:$0xff]  ;;  %v1300_v54 = vld [vmem:[#allocation5 + $0x1d8] sm:$0xff] }
 0x130   :  { %2092 = vmatpush1.bf16.msra.mxu1 %v2091_v58  ;;  %v2111_v58 = vpack.c.bf16 %v425_v52, %v421_v46  ;;  %v461_v46 = vld [vmem:[#allocation2 + $0xb90] sm:$0xff] }
 0x131   :  { %2094 = vmatprep.subr.bf16.mxu1 %v2093_v0  ;;  %v2113_v0 = vpack.c.bf16 %v434_v56, %v430_v38  ;;  %v465_v52 = vld [vmem:[#allocation2 + $0xbb0] sm:$0xff]  ;;  %v470_v38 = vld [vmem:[#allocation2 + $0xbd8] sm:$0xff] }
 0x132   :  { %2220 = vmatpush1.bf16.msra.mxu0 %v2219_v5  ;;  %v2239_v5 = vpack.c.bf16 %v1279_v63, %v1277_v62  ;;  %v474_v56 = vld [vmem:[#allocation2 + $0xbf8] sm:$0xff]  ;;  %v469_v62 = vld [vmem:[#allocation2 + $0xbd0] sm:$0xff] }
 0x133   :  { %2222 = vmatprep.subr.bf16.mxu0 %v2221_v8  ;;  %v2241_v8 = vpack.c.bf16 %v1284_v3, %v1282_v2  ;;  %v473_v63 = vld [vmem:[#allocation2 + $0xbf0] sm:$0xff] }
 0x134   :  { %2096 = vmatpush1.bf16.msra.mxu1 %v2095_v6  ;;  %v2115_v6 = vpack.c.bf16 %v433_v1, %v429_v59  ;;  %v2257_v59 = vpack.c.bf16 %v1300_v54, %v1298_v53  ;;  %v482_v1 = vld [vmem:[#allocation2 + $0xc38] sm:$0xff]  ;;  %v2135_v2 = vpack.c.bf16 %v473_v63, %v469_v62  ;;  %v1301_v54 = vld [vmem:[#allocation5 + $0x1e0] sm:$0xff] }
 0x135   :  { %2098 = vmatprep.subr.bf16.mxu1 %v2097_v12  ;;  %v2117_v12 = vpack.c.bf16 %v442_v33, %v438_v4  ;;  %v477_v4 = vld [vmem:[#allocation2 + $0xc10] sm:$0xff]  ;;  %v546_v62 = vld [vmem:[#allocation2 + $0xe38] sm:$0xff] }
 0x136   :  { %2224 = vmatpush1.bf16.msra.mxu0 %v2223_v17  ;;  %v2243_v17 = vpack.c.bf16 %v1283_v10, %v1281_v9  ;;  %v481_v33 = vld [vmem:[#allocation2 + $0xc30] sm:$0xff] }
 0x137   :  { %2226 = vmatprep.subr.bf16.mxu0 %v2225_v20  ;;  %v2245_v20 = vpack.c.bf16 %v1288_v15, %v1286_v14  ;;  %v485_v9 = vld [vmem:[#allocation2 + $0xc50] sm:$0xff] }
 0x138   :  { %2100 = vmatpush1.bf16.msra.mxu1 %v2099_v18  ;;  %v2119_v18 = vpack.c.bf16 %v441_v13, %v437_v7  ;;  %v2139_v7 = vpack.c.bf16 %v481_v33, %v477_v4  ;;  %v489_v10 = vld [vmem:[#allocation2 + $0xc70] sm:$0xff]  ;;  %v498_v13 = vld [vmem:[#allocation2 + $0xcb8] sm:$0xff]  ;;  %v1306_v33 = vld [vmem:[#allocation5 + $0x208] sm:$0xff] }
 0x139   :  { %2102 = vmatprep.subr.bf16.mxu1 %v2101_v34  ;;  %v2121_v34 = vpack.c.bf16 %v450_v16, %v446_v25  ;;  %v2143_v14 = vpack.c.bf16 %v489_v10, %v485_v9  ;;  %v493_v25 = vld [vmem:[#allocation2 + $0xc90] sm:$0xff]  ;;  %v554_v4 = vld [vmem:[#allocation2 + $0xe78] sm:$0xff] }
 0x13a   :  { %2228 = vmatpush1.bf16.msra.mxu0 %v2227_v29  ;;  %v2247_v29 = vpack.c.bf16 %v1287_v22, %v1285_v21  ;;  %v497_v16 = vld [vmem:[#allocation2 + $0xcb0] sm:$0xff] }
 0x13b   :  { %2230 = vmatprep.subr.bf16.mxu0 %v2229_v31  ;;  %v2249_v31 = vpack.c.bf16 %v1292_v26, %v1290_v24  ;;  %v501_v21 = vld [vmem:[#allocation2 + $0xcd0] sm:$0xff] }
 0x13c   :  { %2104 = vmatpush1.bf16.msra.mxu1 %v2103_v30  ;;  %v2123_v30 = vpack.c.bf16 %v449_v23, %v445_v19  ;;  %v2147_v19 = vpack.c.bf16 %v497_v16, %v493_v25  ;;  %v505_v22 = vld [vmem:[#allocation2 + $0xcf0] sm:$0xff]  ;;  %v514_v23 = vld [vmem:[#allocation2 + $0xd38] sm:$0xff] }
 0x13d   :  { %2106 = vmatprep.subr.bf16.mxu1 %v2105_v48  ;;  %v2125_v48 = vpack.c.bf16 %v458_v28, %v454_v27  ;;  %v509_v26 = vld [vmem:[#allocation2 + $0xd10] sm:$0xff]  ;;  %v518_v27 = vld [vmem:[#allocation2 + $0xd58] sm:$0xff] }
 0x13e   :  { %2232 = vmatpush1.bf16.msra.mxu0 %v2231_v43  ;;  %v2251_v43 = vpack.c.bf16 %v1291_v35, %v1289_v32  ;;  %v522_v28 = vld [vmem:[#allocation2 + $0xd78] sm:$0xff]  ;;  %v549_v9 = vld [vmem:[#allocation2 + $0xe50] sm:$0xff] }
 0x13f   :  { %2234 = vmatprep.subr.bf16.mxu0 %v2233_v47  ;;  %v2253_v47 = vpack.c.bf16 %v1296_v39, %v1294_v37  ;;  %v526_v32 = vld [vmem:[#allocation2 + $0xd98] sm:$0xff]  ;;  %v1299_v37 = vld [vmem:[#allocation5 + $0x1d0] sm:$0xff] }
 0x140   :  { %2108 = vmatpush1.bf16.msra.mxu1 %v2107_v45  ;;  %v2127_v45 = vpack.c.bf16 %v457_v36, %v453_v41  ;;  %v517_v41 = vld [vmem:[#allocation2 + $0xd50] sm:$0xff]  ;;  %v530_v35 = vld [vmem:[#allocation2 + $0xdb8] sm:$0xff]  ;;  %v1297_v36 = vld [vmem:[#allocation5 + $0x1c0] sm:$0xff] }
 0x141   :  { %2110 = vmatprep.subr.bf16.mxu1 %v2109_v51  ;;  %v2129_v51 = vpack.c.bf16 %v466_v42, %v462_v40  ;;  %v2161_v39 = vpack.c.bf16 %v530_v35, %v526_v32  ;;  %v525_v40 = vld [vmem:[#allocation2 + $0xd90] sm:$0xff]  ;;  %v590_v32 = vld [vmem:[#allocation2 + $0xf98] sm:$0xff] }
 0x142   :  { %2236 = vmatpush1.bf16.msra.mxu0 %v2235_v57  ;;  %v2255_v57 = vpack.c.bf16 %v1295_v50, %v1293_v49  ;;  %v529_v42 = vld [vmem:[#allocation2 + $0xdb0] sm:$0xff]  ;;  %v1302_v50 = vld [vmem:[#allocation5 + $0x1e8] sm:$0xff]  ;;  %v594_v35 = vld [vmem:[#allocation2 + $0xfb8] sm:$0xff] }
 0x143   :  { %2238 = vmatprep.subr.bf16.mxu0 %v2237_v60  ;;  %v2133_v60 = vpack.c.bf16 %v474_v56, %v470_v38  ;;  %v1303_v38 = vld [vmem:[#allocation5 + $0x1f0] sm:$0xff] }
 0x144   :  { %2112 = vmatpush1.bf16.msra.mxu1 %v2111_v58  ;;  %v2131_v58 = vpack.c.bf16 %v465_v52, %v461_v46  ;;  %v534_v46 = vld [vmem:[#allocation2 + $0xdd8] sm:$0xff]  ;;  %v2163_v52 = vpack.c.bf16 %v529_v42, %v525_v40  ;;  %v553_v10 = vld [vmem:[#allocation2 + $0xe70] sm:$0xff] }
 0x145   :  { %2114 = vmatprep.subr.bf16.mxu1 %v2113_v0  ;;  %v478_v0 = vld [vmem:[#allocation2 + $0xc18] sm:$0xff]  ;;  %v557_v25 = vld [vmem:[#allocation2 + $0xe90] sm:$0xff] }
 0x146   :  { %2240 = vmatpush1.bf16.msra.mxu0 %v2239_v5  ;;  %v2137_v3 = vpack.c.bf16 %v482_v1, %v478_v0  ;;  %v486_v5 = vld [vmem:[#allocation2 + $0xc58] sm:$0xff]  ;;  %v541_v1 = vld [vmem:[#allocation2 + $0xe10] sm:$0xff] }
 0x147   :  { %2242 = vmatprep.subr.bf16.mxu0 %v2241_v8  ;;  %v561_v16 = vld [vmem:[#allocation2 + $0xeb0] sm:$0xff]  ;;  %v598_v40 = vld [vmem:[#allocation2 + $0xfd8] sm:$0xff] }
 0x148   :  { %2116 = vmatpush1.bf16.msra.mxu1 %v2115_v6  ;;  %v490_v6 = vld [vmem:[#allocation2 + $0xc78] sm:$0xff] }
 0x149   :  { %2118 = vmatprep.subr.bf16.mxu1 %v2117_v12  ;;  %v2141_v8 = vpack.c.bf16 %v490_v6, %v486_v5  ;;  %v494_v12 = vld [vmem:[#allocation2 + $0xc98] sm:$0xff] }
 0x14a   :  { %2244 = vmatpush1.bf16.msra.mxu0 %v2243_v17  ;;  %v2145_v15 = vpack.c.bf16 %v498_v13, %v494_v12  ;;  %v502_v17 = vld [vmem:[#allocation2 + $0xcd8] sm:$0xff] }
 0x14b   :  { %2246 = vmatprep.subr.bf16.mxu0 %v2245_v20  ;;  %v1308_v5 = vld [vmem:[#allocation5 + $0x218] sm:$0xff] }
 0x14c   :  { %2120 = vmatpush1.bf16.msra.mxu1 %v2119_v18  ;;  %v506_v18 = vld [vmem:[#allocation2 + $0xcf8] sm:$0xff]  ;;  %v2265_v6 = vpack.c.bf16 %v1308_v5, %v1306_v33  ;;  %v1309_v33 = vld [vmem:[#allocation5 + $0x220] sm:$0xff] }
 0x14d   :  { %2122 = vmatprep.subr.bf16.mxu1 %v2121_v34  ;;  %v2149_v20 = vpack.c.bf16 %v506_v18, %v502_v17  ;;  %v510_v34 = vld [vmem:[#allocation2 + $0xd18] sm:$0xff] }
 0x14e   :  { %2248 = vmatpush1.bf16.msra.mxu0 %v2247_v29  ;;  %v2153_v24 = vpack.c.bf16 %v514_v23, %v510_v34  ;;  %v558_v12 = vld [vmem:[#allocation2 + $0xe98] sm:$0xff] }
 0x14f   :  { %2250 = vmatprep.subr.bf16.mxu0 %v2249_v31  ;;  %v521_v31 = vld [vmem:[#allocation2 + $0xd70] sm:$0xff]  ;;  %v562_v13 = vld [vmem:[#allocation2 + $0xeb8] sm:$0xff] }
 0x150   :  { %2124 = vmatpush1.bf16.msra.mxu1 %v2123_v30  ;;  %v2157_v30 = vpack.c.bf16 %v522_v28, %v518_v27  ;;  %v566_v17 = vld [vmem:[#allocation2 + $0xed8] sm:$0xff] }
 0x151   :  { %2126 = vmatprep.subr.bf16.mxu1 %v2125_v48  ;;  %v2159_v48 = vpack.c.bf16 %v521_v31, %v517_v41  ;;  %v570_v18 = vld [vmem:[#allocation2 + $0xef8] sm:$0xff]  ;;  %v581_v41 = vld [vmem:[#allocation2 + $0xf50] sm:$0xff] }
 0x152   :  { %2252 = vmatpush1.bf16.msra.mxu0 %v2251_v43  ;;  %v2259_v43 = vpack.c.bf16 %v1299_v37, %v1297_v36  ;;  %v574_v34 = vld [vmem:[#allocation2 + $0xf18] sm:$0xff]  ;;  %v585_v31 = vld [vmem:[#allocation2 + $0xf70] sm:$0xff]  ;;  %v2193_v36 = vpack.c.bf16 %v594_v35, %v590_v32  ;;  %v1317_v32 = vld [vmem:[#allocation5 + $0x260] sm:$0xff] }
 0x153   :  { %2254 = vmatprep.subr.bf16.mxu0 %v2253_v47  ;;  %v538_v47 = vld [vmem:[#allocation2 + $0xdf8] sm:$0xff]  ;;  %v589_v37 = vld [vmem:[#allocation2 + $0xf90] sm:$0xff] }
 0x154   :  { %2128 = vmatpush1.bf16.msra.mxu1 %v2127_v45  ;;  %v2165_v56 = vpack.c.bf16 %v538_v47, %v534_v46  ;;  %v578_v23 = vld [vmem:[#allocation2 + $0xf38] sm:$0xff]  ;;  %v597_v47 = vld [vmem:[#allocation2 + $0xfd0] sm:$0xff] }
 0x155   :  { %2130 = vmatprep.subr.bf16.mxu1 %v2129_v51  ;;  %v1304_v51 = vld [vmem:[#allocation5 + $0x1f8] sm:$0xff]  ;;  %v1319_v35 = vld [vmem:[#allocation5 + $0x270] sm:$0xff] }
 0x156   :  { %2256 = vmatpush1.bf16.msra.mxu0 %v2255_v57  ;;  %v2261_v53 = vpack.c.bf16 %v1304_v51, %v1302_v50  ;;  %v533_v57 = vld [vmem:[#allocation2 + $0xdd0] sm:$0xff]  ;;  %v582_v27 = vld [vmem:[#allocation2 + $0xf58] sm:$0xff] }
 0x157   :  { %2258 = vmatprep.subr.bf16.mxu0 %v2257_v59  ;;  %v2263_v59 = vpack.c.bf16 %v1303_v38, %v1301_v54  ;;  %v586_v28 = vld [vmem:[#allocation2 + $0xf78] sm:$0xff]  ;;  %v601_v50 = vld [vmem:[#allocation2 + $0xff0] sm:$0xff]  ;;  %v611_v54 = vsub.s32 1, %v2645_v61 }
 0x158   :  { %2132 = vmatpush1.bf16.msra.mxu1 %v2131_v58  ;;  %v537_v58 = vld [vmem:[#allocation2 + $0xdf0] sm:$0xff]  ;;  %v602_v42 = vld [vmem:[#allocation2 + $0xff8] sm:$0xff]  ;;  %v2199_v51 = vpack.c.bf16 %v601_v50, %v597_v47  ;;  %v1550_v47 = vld [vmem:[%s2840_s3 + $0xc8] sm:$0xff] }
 0x159   :  { %2134 = vmatprep.subr.bf16.mxu1 %v2133_v60  ;;  %v542_v60 = vld [vmem:[#allocation2 + $0xe18] sm:$0xff]  ;;  %v2167_v63 = vpack.c.bf16 %v537_v58, %v533_v57  ;;  %v2197_v46 = vpack.c.bf16 %v602_v42, %v598_v40  ;;  %v1531_v40 = vld [vmem:[%s2840_s3 + $0x30] sm:$0xff] }
 0x15a   :  { %2260 = vmatpush1.bf16.msra.mxu0 %v2259_v43  ;;  %v2169_v0 = vpack.c.bf16 %v546_v62, %v542_v60  ;;  %v1305_v62 = vld [vmem:[#allocation5 + $0x200] sm:$0xff]  ;;  %v1532_v42 = vld [vmem:[%s2840_s3 + $0x38] sm:$0xff] }
 0x15b   :  { %2262 = vmatprep.subr.bf16.mxu0 %v2261_v53  ;;  %v2710_v53 = vld [vmem:[#allocation7] sm:$0xf] }
 0x15c   :  { %2136 = vmatpush1.bf16.msra.mxu1 %v2135_v2  ;;  %v545_v2 = vld [vmem:[#allocation2 + $0xe30] sm:$0xff] }
 0x15d   :  { %2138 = vmatprep.subr.bf16.mxu1 %v2137_v3  ;;  %v550_v3 = vld [vmem:[#allocation2 + $0xe58] sm:$0xff] }
 0x15e   :  { %2264 = vmatpush1.bf16.msra.mxu0 %v2263_v59 }
 0x15f   :  { %1160 = vmatmul.mubr.f32.vlgmr.msra.gmra.mrb[2].mxu1 %v2679_v44  ;;  %v2151_v44 = vpack.c.bf16 %v505_v22, %v501_v21  ;;  %2266 = vmatprep.subr.bf16.mxu0 %v2265_v6  ;;  %v565_v21 = vld [vmem:[#allocation2 + $0xed0] sm:$0xff] }
 0x160   :  { %2140 = vmatpush1.bf16.msra.mxu1 %v2139_v7  ;;  %1230 = vmatprep.mubr.f32.mxu1 %v2693_v11  ;;  %v513_v11 = vld [vmem:[#allocation2 + $0xd30] sm:$0xff]  ;;  %v2171_v7 = vpack.c.bf16 %v545_v2, %v541_v1  ;;  %v1310_v1 = vld [vmem:[#allocation5 + $0x228] sm:$0xff]  ;;  %v1312_v2 = vld [vmem:[#allocation5 + $0x238] sm:$0xff] }
 0x161   :  { %2142 = vmatprep.subr.bf16.mxu1 %v2141_v8  ;;  %v2155_v29 = vpack.c.bf16 %v513_v11, %v509_v26  ;;  %v2173_v8 = vpack.c.bf16 %v554_v4, %v550_v3  ;;  %v569_v22 = vld [vmem:[#allocation2 + $0xef0] sm:$0xff]  ;;  %v2269_v6 = vpack.c.bf16 %v1312_v2, %v1310_v1  ;;  %v1325_v2 = vld [vmem:[#allocation5 + $0x2a0] sm:$0xff] }
 0x162   :  { %v573_v26 = vld [vmem:[#allocation2 + $0xf10] sm:$0xff] }
 0x163   :  { %v577_v11 = vld [vmem:[#allocation2 + $0xf30] sm:$0xff] }
 0x164   :  { %2144 = vmatpush1.bf16.msra.mxu1 %v2143_v14  ;;  %v2175_v14 = vpack.c.bf16 %v553_v10, %v549_v9  ;;  %v1316_v9 = vld [vmem:[#allocation5 + $0x258] sm:$0xff]  ;;  %v1525_v10 = vld [vmem:[%s2840_s3] sm:$0xff] }
 0x165   :  { %2146 = vmatprep.subr.bf16.mxu1 %v2145_v15  ;;  %v2177_v15 = vpack.c.bf16 %v562_v13, %v558_v12  ;;  %v1526_v13 = vld [vmem:[%s2840_s3 + $0x8] sm:$0xff] }
 0x168   :  { %2148 = vmatpush1.bf16.msra.mxu1 %v2147_v19  ;;  %v2179_v19 = vpack.c.bf16 %v561_v16, %v557_v25  ;;  %v2331_v16 = vpack.c.bf16 %v1526_v13, %v1525_v10  ;;  %v1331_v13 = vld [vmem:[#allocation5 + $0x2d0] sm:$0xff] }
 0x169   :  { %2150 = vmatprep.subr.bf16.mxu1 %v2149_v20  ;;  %v2181_v20 = vpack.c.bf16 %v570_v18, %v566_v17  ;;  %v1527_v18 = vld [vmem:[%s2840_s3 + $0x10] sm:$0xff] }
 0x16c   :  { %2152 = vmatpush1.bf16.msra.mxu1 %v2151_v44  ;;  %v2183_v44 = vpack.c.bf16 %v569_v22, %v565_v21  ;;  %v1313_v22 = vld [vmem:[#allocation5 + $0x240] sm:$0xff] }
 0x16d   :  { %2154 = vmatprep.subr.bf16.mxu1 %v2153_v24  ;;  %v2185_v24 = vpack.c.bf16 %v578_v23, %v574_v34  ;;  %v1315_v34 = vld [vmem:[#allocation5 + $0x250] sm:$0xff]  ;;  %v1546_v23 = vld [vmem:[%s2840_s3 + $0xa8] sm:$0xff] }
 0x170   :  { %2156 = vmatpush1.bf16.msra.mxu1 %v2155_v29  ;;  %v2187_v29 = vpack.c.bf16 %v577_v11, %v573_v26 }
 0x171   :  { %2158 = vmatprep.subr.bf16.mxu1 %v2157_v30  ;;  %v2189_v30 = vpack.c.bf16 %v586_v28, %v582_v27  ;;  %v1529_v27 = vld [vmem:[%s2840_s3 + $0x20] sm:$0xff]  ;;  %v1530_v28 = vld [vmem:[%s2840_s3 + $0x28] sm:$0xff] }
 0x172   :  { %v2704_v45 = vpop.f32.mrb[0].mxu1 }
 0x173   :  { %v2706_v49 = vpop.f32.mrb[1].mxu1 }
 0x174   :  { %2160 = vmatpush1.bf16.msra.mxu1 %v2159_v48  ;;  %v2191_v48 = vpack.c.bf16 %v585_v31, %v581_v41  ;;  %v1548_v41 = vld [vmem:[%s2840_s3 + $0xb8] sm:$0xff] }
 0x175   :  { %2162 = vmatprep.subr.bf16.mxu1 %v2161_v39  ;;  %v593_v39 = vld [vmem:[#allocation2 + $0xfb0] sm:$0xff] }
 0x176   :  { %v2195_v43 = vpack.c.bf16 %v593_v39, %v589_v37  ;;  %v2339_v37 = vpack.c.bf16 %v1530_v28, %v1529_v27 }
 0x178   :  { %2164 = vmatpush1.bf16.msra.mxu1 %v2163_v52  ;;  %v607_v52 = vsub.s32 0, %v2645_v61 }
 0x179   :  { %2166 = vmatprep.subr.bf16.mxu1 %v2165_v56  ;;  %v612_v56 = vrot.slane %v2710_v53, %v611_v54 }
 0x17a   :  { %v608_v38 = vrot.slane %v2710_v53, %v607_v52 }
 0x17b   :  { %v738_v58 = vadd.f32 %v2706_v49, %v612_v56  ;;  %v1542_v49 = vld [vmem:[%s2840_s3 + $0x88] sm:$0xff] }
 0x17c   :  { %2168 = vmatpush1.bf16.msra.mxu1 %v2167_v63  ;;  %v736_v57 = vadd.f32 %v2704_v45, %v608_v38  ;;  %v1307_v63 = vld [vmem:[#allocation5 + $0x210] sm:$0xff]  ;;  %v1541_v45 = vld [vmem:[%s2840_s3 + $0x80] sm:$0xff]  ;;  %v1326_v56 = vld [vmem:[#allocation5 + $0x2a8] sm:$0xff] }
 0x17d   :  { %2170 = vmatprep.subr.bf16.mxu1 %v2169_v0  ;;  %v2267_v4 = vpack.c.bf16 %v1307_v63, %v1305_v62  ;;  %v2329_v12 = vpack.c.bf16 %v1542_v49, %v1541_v45  ;;  %v1323_v38 = vld [vmem:[#allocation5 + $0x290] sm:$0xff]  ;;  %v1553_v45 = vld [vmem:[%s2840_s3 + $0xe0] sm:$0xff]  ;;  %v1554_v49 = vld [vmem:[%s2840_s3 + $0xe8] sm:$0xff] }
 0x17e   :  { %v1551_v63 = vld [vmem:[%s2840_s3 + $0xd0] sm:$0xff] }
 0x180   :  { %2172 = vmatpush1.bf16.msra.mxu1 %v2171_v7  ;;  %v1311_v7 = vld [vmem:[#allocation5 + $0x230] sm:$0xff] }
 0x181   :  { %2174 = vmatprep.subr.bf16.mxu1 %v2173_v8  ;;  %v1314_v8 = vld [vmem:[#allocation5 + $0x248] sm:$0xff]  ;;  %v2271_v25 = vpack.c.bf16 %v1311_v7, %v1309_v33  ;;  %v1332_v33 = vld [vmem:[#allocation5 + $0x2d8] sm:$0xff]  ;;  %v1535_v7 = vld [vmem:[%s2840_s3 + $0x50] sm:$0xff] }
 0x182   :  { %v2273_v21 = vpack.c.bf16 %v1316_v9, %v1314_v8  ;;  %v1536_v8 = vld [vmem:[%s2840_s3 + $0x58] sm:$0xff] }
 0x184   :  { %2176 = vmatpush1.bf16.msra.mxu1 %v2175_v14  ;;  %v1543_v14 = vld [vmem:[%s2840_s3 + $0x90] sm:$0xff] }
 0x185   :  { %2178 = vmatprep.subr.bf16.mxu1 %v2177_v15  ;;  %v1544_v15 = vld [vmem:[%s2840_s3 + $0x98] sm:$0xff] }
 0x186   :  { %v2333_v17 = vpack.c.bf16 %v1544_v15, %v1543_v14  ;;  %v1334_v14 = vld [vmem:[#allocation5 + $0x2e8] sm:$0xff]  ;;  %v1336_v15 = vld [vmem:[#allocation5 + $0x2f8] sm:$0xff] }
 0x188   :  { %2180 = vmatpush1.bf16.msra.mxu1 %v2179_v19  ;;  %v1528_v19 = vld [vmem:[%s2840_s3 + $0x18] sm:$0xff] }
 0x189   :  { %2182 = vmatprep.subr.bf16.mxu1 %v2181_v20  ;;  %v1545_v20 = vld [vmem:[%s2840_s3 + $0xa0] sm:$0xff]  ;;  %v2335_v26 = vpack.c.bf16 %v1528_v19, %v1527_v18  ;;  %v2293_v18 = vpack.c.bf16 %v1336_v15, %v1334_v14 }
 0x18a   :  { %v2337_v11 = vpack.c.bf16 %v1546_v23, %v1545_v20  ;;  %v1333_v19 = vld [vmem:[#allocation5 + $0x2e0] sm:$0xff]  ;;  %v1335_v20 = vld [vmem:[#allocation5 + $0x2f0] sm:$0xff] }
 0x18c   :  { %2184 = vmatpush1.bf16.msra.mxu1 %v2183_v44  ;;  %v1318_v44 = vld [vmem:[#allocation5 + $0x268] sm:$0xff] }
 0x18d   :  { %2186 = vmatprep.subr.bf16.mxu1 %v2185_v24  ;;  %v1320_v24 = vld [vmem:[#allocation5 + $0x278] sm:$0xff] }
 0x18e   :  { %v2277_v31 = vpack.c.bf16 %v1320_v24, %v1318_v44  ;;  %v1337_v44 = vld [vmem:[#allocation5 + $0x300] sm:$0xff]  ;;  %v1339_v24 = vld [vmem:[#allocation5 + $0x310] sm:$0xff] }
 0x18f   :  { %v2299_v27 = vpack.c.bf16 %v1339_v24, %v1337_v44  ;;  %v1539_v44 = vld [vmem:[%s2840_s3 + $0x70] sm:$0xff]  ;;  %v1540_v24 = vld [vmem:[%s2840_s3 + $0x78] sm:$0xff] }
 0x190   :  { %2188 = vmatpush1.bf16.msra.mxu1 %v2187_v29  ;;  %v2275_v29 = vpack.c.bf16 %v1315_v34, %v1313_v22  ;;  %v1340_v22 = vld [vmem:[#allocation5 + $0x318] sm:$0xff]  ;;  %v2295_v34 = vpack.c.bf16 %v1335_v20, %v1333_v19  ;;  %v1537_v20 = vld [vmem:[%s2840_s3 + $0x60] sm:$0xff] }
 0x191   :  { %2190 = vmatprep.subr.bf16.mxu1 %v2189_v30  ;;  %v1547_v30 = vld [vmem:[%s2840_s3 + $0xb0] sm:$0xff] }
 0x192   :  { %v2341_v39 = vpack.c.bf16 %v1548_v41, %v1547_v30  ;;  %v1343_v30 = vld [vmem:[#allocation5 + $0x330] sm:$0xff]  ;;  %v1346_v41 = vld [vmem:[#allocation5 + $0x348] sm:$0xff] }
 0x194   :  { %2192 = vmatpush1.bf16.msra.mxu1 %v2191_v48  ;;  %v1322_v48 = vld [vmem:[#allocation5 + $0x288] sm:$0xff] }
 0x195   :  { %2194 = vmatprep.subr.bf16.mxu1 %v2193_v36  ;;  %v1324_v36 = vld [vmem:[#allocation5 + $0x298] sm:$0xff] }
 0x196   :  { %v2281_v50 = vpack.c.bf16 %v1324_v36, %v1322_v48  ;;  %v1345_v48 = vld [vmem:[#allocation5 + $0x340] sm:$0xff]  ;;  %v1347_v36 = vld [vmem:[#allocation5 + $0x350] sm:$0xff] }
 0x198   :  { %2196 = vmatpush1.bf16.msra.mxu1 %v2195_v43  ;;  %v2279_v43 = vpack.c.bf16 %v1319_v35, %v1317_v32 }
 0x199   :  { %2198 = vmatprep.subr.bf16.mxu1 %v2197_v46  ;;  %v1549_v46 = vld [vmem:[%s2840_s3 + $0xc0] sm:$0xff] }
 0x19c   :  { %2200 = vmatpush1.bf16.msra.mxu1 %v2199_v51  ;;  %v1321_v51 = vld [vmem:[#allocation5 + $0x280] sm:$0xff] }
 0x19d   :  { %2330 = vmatprep.subr.bf16.mxu1 %v2329_v12  ;;  %v2283_v62 = vpack.c.bf16 %v1323_v38, %v1321_v51  ;;  %v1329_v12 = vld [vmem:[#allocation5 + $0x2c0] sm:$0xff] }
 0x19f   :  { %1231 = vmatmul.mubr.f32.vlgmr.msra.gmra.mrb[2].mxu1 %v2689_v55 }
 0x1a0   :  { %2332 = vmatpush3.bf16.msra.mxu1 %v2331_v16  ;;  %v2353_v16 = vpack.c.bf16 %v1554_v49, %v1553_v45  ;;  %v1367_v45 = vld [vmem:[#allocation5 + $0x3f0] sm:$0xff] }
 0x1a1   :  { %2334 = vmatprep.subr.bf16.mxu1 %v2333_v17  ;;  %v2291_v17 = vpack.c.bf16 %v1331_v13, %v1329_v12  ;;  %v619_v12 = vsub.s32 3, %v2645_v61 }
 0x1a3   :  { %v620_v14 = vrot.slane %v2710_v53, %v619_v12 }
 0x1a4   :  { %2336 = vmatpush3.bf16.msra.mxu1 %v2335_v26  ;;  %v1342_v26 = vld [vmem:[#allocation5 + $0x328] sm:$0xff] }
 0x1a5   :  { %2338 = vmatprep.subr.bf16.mxu1 %v2337_v11  ;;  %v1344_v11 = vld [vmem:[#allocation5 + $0x338] sm:$0xff] }
 0x1a6   :  { %v2301_v28 = vpack.c.bf16 %v1344_v11, %v1342_v26  ;;  %v2359_v26 = vpack.c.bf16 %v1540_v24, %v1539_v44  ;;  %v1369_v11 = vld [vmem:[#allocation8] sm:$0x3] }
 0x1a8   :  { %2340 = vmatpush3.bf16.msra.mxu1 %v2339_v37  ;;  %v1350_v37 = vld [vmem:[#allocation5 + $0x368] sm:$0xff] }
 0x1a9   :  { %2342 = vmatprep.subr.bf16.mxu1 %v2341_v39  ;;  %v1352_v39 = vld [vmem:[#allocation5 + $0x378] sm:$0xff] }
 0x1f4   :  { %v948_v59 = vpop.f32.mrb[0].mxu0 }
 0x1f5   :  { %v2362_v55 = vadd.f32 %v948_v59, %v736_v57  ;;  %v950_v60 = vpop.f32.mrb[1].mxu0  ;;  %v1328_v57 = vld [vmem:[#allocation5 + $0x2b8] sm:$0xff]  ;;  %v2345_v59 = vpack.c.bf16 %v1550_v47, %v1549_v46  ;;  %v1351_v46 = vld [vmem:[#allocation5 + $0x370] sm:$0xff]  ;;  %v1354_v47 = vld [vmem:[#allocation5 + $0x388] sm:$0xff] }
 0x1f6   :  { %v2364_v0 = vadd.f32 %v950_v60, %v738_v58  ;;  %v2343_v58 = vpack.c.bf16 %v1532_v42, %v1531_v40  ;;  %v1534_v60 = vld [vmem:[%s2840_s3 + $0x48] sm:$0xff]  ;;  %v2285_v1 = vpack.c.bf16 %v1328_v57, %v1326_v56  ;;  %v2307_v40 = vpack.c.bf16 %v1347_v36, %v1345_v48  ;;  %v1353_v56 = vld [vmem:[#allocation5 + $0x380] sm:$0xff]  ;;  %v1355_v57 = vld [vmem:[#allocation5 + $0x390] sm:$0xff] }
 0x1f7   :  { %v1237_v5 = vmax.f32 %v2362_v55, 0.0  ;;  %v1533_v55 = vld [vmem:[%s2840_s3 + $0x40] sm:$0xff]  ;;  %v2309_v42 = vpack.c.bf16 %v1352_v39, %v1350_v37 }
 0x1f8   :  { %v1238_v3 = vmax.f32 %v2364_v0, 0.0  ;;  %v1552_v0 = vld [vmem:[%s2840_s3 + $0xd8] sm:$0xff]  ;;  %2344 = vmatpush3.bf16.msra.mxu1 %v2343_v58  ;;  %v1358_v58 = vld [vmem:[#allocation5 + $0x3a8] sm:$0xff]  ;;  %v1653_v36 = vld [vmem:[#allocation10] ss:$0 sm:$0xff] }
 0x1f9   :  { %2346 = vmatprep.subr.bf16.mxu1 %v2345_v59  ;;  %v1360_v59 = vld [vmem:[#allocation5 + $0x3b8] sm:$0xff] }
 0x1fa   :  { %1445 = vmatprep.mubr.f32.mxu0 %v1238_v3  ;;  %v1327_v3 = vld [vmem:[#allocation5 + $0x2b0] sm:$0xff] }
 0x1fb   :  { %1446 = vmatmul.mubr.f32.vlgmr.msra.gmra.mrb[2].mxu0 %v1237_v5  ;;  %v2347_v5 = vpack.c.bf16 %v1534_v60, %v1533_v55  ;;  %v2287_v9 = vpack.c.bf16 %v1327_v3, %v1325_v2  ;;  %v2315_v55 = vpack.c.bf16 %v1355_v57, %v1353_v56  ;;  %v2317_v60 = vpack.c.bf16 %v1360_v59, %v1358_v58 }
 0x1fc   :  { %2268 = vmatpush1.bf16.msra.mxu0 %v2267_v4  ;;  %v1330_v4 = vld [vmem:[#allocation5 + $0x2c8] sm:$0xff] }
 0x1fd   :  { %2270 = vmatprep.subr.bf16.mxu0 %v2269_v6  ;;  %v2349_v6 = vpack.c.bf16 %v1552_v0, %v1551_v63  ;;  %v2289_v10 = vpack.c.bf16 %v1332_v33, %v1330_v4  ;;  %2348 = vmatpush3.bf16.msra.mxu1 %v2347_v5  ;;  %v1359_v63 = vld [vmem:[#allocation5 + $0x3b0] sm:$0xff]  ;;  %v1362_v0 = vld [vmem:[#allocation5 + $0x3c8] sm:$0xff]  ;;  %v1361_v4 = vld [vmem:[#allocation5 + $0x3c0] sm:$0xff] }
 0x1fe   :  { %v1363_v33 = vld [vmem:[#allocation5 + $0x3d0] sm:$0xff]  ;;  %v1366_v5 = vld [vmem:[#allocation5 + $0x3e8] sm:$0xff] }
 0x1ff   :  { %2350 = vmatprep.subr.bf16.mxu1 %v2349_v6  ;;  %v1368_v6 = vld [vmem:[#allocation5 + $0x3f8] sm:$0xff] }
 0x200   :  { %2272 = vmatpush1.bf16.msra.mxu0 %v2271_v25  ;;  %v2351_v25 = vpack.c.bf16 %v1536_v8, %v1535_v7  ;;  %v2323_v7 = vpack.c.bf16 %v1363_v33, %v1361_v4  ;;  %v2325_v8 = vpack.c.bf16 %v1368_v6, %v1366_v5 }
 0x201   :  { %2274 = vmatprep.subr.bf16.mxu0 %v2273_v21  ;;  %v1338_v21 = vld [vmem:[#allocation5 + $0x308] sm:$0xff] }
 0x202   :  { %2352 = vmatpush3.bf16.msra.mxu1 %v2351_v25  ;;  %v2297_v23 = vpack.c.bf16 %v1340_v22, %v1338_v21  ;;  %v1538_v21 = vld [vmem:[%s2840_s3 + $0x68] sm:$0xff] }
 0x203   :  { %2354 = vmatprep.subr.bf16.mxu1 %v2353_v16  ;;  %v2355_v22 = vpack.c.bf16 %v1538_v21, %v1537_v20 }
 0x204   :  { %2276 = vmatpush1.bf16.msra.mxu0 %v2275_v29  ;;  %v1341_v29 = vld [vmem:[#allocation5 + $0x320] sm:$0xff] }
 0x205   :  { %2278 = vmatprep.subr.bf16.mxu0 %v2277_v31  ;;  %v1348_v31 = vld [vmem:[#allocation5 + $0x358] sm:$0xff]  ;;  %v2303_v32 = vpack.c.bf16 %v1343_v30, %v1341_v29 }
 0x206   :  { %v2305_v35 = vpack.c.bf16 %v1348_v31, %v1346_v41  ;;  %2356 = vmatpush3.bf16.msra.mxu1 %v2355_v22 }
 0x208   :  { %2280 = vmatpush1.bf16.msra.mxu0 %v2279_v43  ;;  %v1349_v43 = vld [vmem:[#allocation5 + $0x360] sm:$0xff] }
 0x209   :  { %2282 = vmatprep.subr.bf16.mxu0 %v2281_v50  ;;  %v1356_v50 = vld [vmem:[#allocation5 + $0x398] sm:$0xff]  ;;  %v2311_v51 = vpack.c.bf16 %v1351_v46, %v1349_v43 }
 0x20a   :  { %v2313_v38 = vpack.c.bf16 %v1356_v50, %v1354_v47 }
 0x20c   :  { %2284 = vmatpush1.bf16.msra.mxu0 %v2283_v62  ;;  %v1357_v62 = vld [vmem:[#allocation5 + $0x3a0] sm:$0xff] }
 0x20d   :  { %2286 = vmatprep.subr.bf16.mxu0 %v2285_v1  ;;  %v1364_v1 = vld [vmem:[#allocation5 + $0x3d8] sm:$0xff]  ;;  %v2319_v2 = vpack.c.bf16 %v1359_v63, %v1357_v62 }
 0x20e   :  { %v2321_v3 = vpack.c.bf16 %v1364_v1, %v1362_v0 }
 0x210   :  { %2288 = vmatpush1.bf16.msra.mxu0 %v2287_v9  ;;  %v1365_v9 = vld [vmem:[#allocation5 + $0x3e0] sm:$0xff] }
 0x211   :  { %2290 = vmatprep.subr.bf16.mxu0 %v2289_v10  ;;  %v2327_v49 = vpack.c.bf16 %v1367_v45, %v1365_v9  ;;  %v615_v10 = vsub.s32 2, %v2645_v61 }
 0x213   :  { %v616_v13 = vrot.slane %v2710_v53, %v615_v10  ;;  %v1555_v53 = vld [vmem:[%s2840_s3 + $0xf0] sm:$0xff] }
 0x214   :  { %2292 = vmatpush1.bf16.msra.mxu0 %v2291_v17 }
 0x215   :  { %2294 = vmatprep.subr.bf16.mxu0 %v2293_v18 }
 0x218   :  { %2296 = vmatpush1.bf16.msra.mxu0 %v2295_v34  ;;  %v1556_v34 = vld [vmem:[%s2840_s3 + $0xf8] sm:$0xff]  ;;  %s2544_s3 = smov [#allocation11]  }
 0x219   :  { %2298 = vmatprep.subr.bf16.mxu0 %v2297_v23  ;;  %v2357_v23 = vpack.c.bf16 %v1556_v34, %v1555_v53  ;;  %s1642_s23 = sshll.u32 %s2544_s3, 4  ;;  %s1643_s23 = int_to_ptr.vmem [resolvable:$true] %s1642_s23 }
 0x21a   :  { %s2504_s24 = scalar_lea.vmem %s1643_s23, 32  ;;  %p2509_p13 = scmp.lt.s32.totalorder %s1643_s23, %s1643_s23 }
 0x21b   :  { %2358 = vmatprep.subr.bf16.mxu1 %v2357_v23  ;;  %p2505_p12 = scmp.ne.s32.totalorder %s1643_s23, %s2504_s24  ;;  %p2510_p0 = scmp.lt.s32.totalorder %s2504_s24, %s2504_s24 }
 0x21c   :  { %2300 = vmatpush1.bf16.msra.mxu0 %v2299_v27  ;;  %2360 = vmatpush3.bf16.msra.mxu1 %v2359_v26  ;;  %v1374_v27 = vrot.slane %v1369_v11, %v607_v52 }
 0x21d   :  { %2302 = vmatprep.subr.bf16.mxu0 %v2301_v28  ;;  %v1378_v28 = vrot.slane %v1369_v11, %v611_v54  ;;  %p2511_p1 = por %p2510_p0, %p2509_p13 }
 0x21f   :  { %p2512_p2 = pnand %p2511_p1, %p2505_p12 }
 0x220   :  { %2304 = vmatpush1.bf16.msra.mxu0 %v2303_v32 }
 0x221   :  { %2306 = vmatprep.subr.bf16.mxu0 %v2305_v35 }
 0x224   :  { %2308 = vmatpush1.bf16.msra.mxu0 %v2307_v40 }
 0x225   :  { %2310 = vmatprep.subr.bf16.mxu0 %v2309_v42 }
 0x228   :  { %2312 = vmatpush1.bf16.msra.mxu0 %v2311_v51 }
 0x229   :  { %2314 = vmatprep.subr.bf16.mxu0 %v2313_v38 }
 0x22c   :  { %2316 = vmatpush1.bf16.msra.mxu0 %v2315_v55 }
 0x22d   :  { %2318 = vmatprep.subr.bf16.mxu0 %v2317_v60 }
 0x230   :  { %2320 = vmatpush1.bf16.msra.mxu0 %v2319_v2 }
 0x231   :  { %2322 = vmatprep.subr.bf16.mxu0 %v2321_v3 }
 0x234   :  { %2324 = vmatpush1.bf16.msra.mxu0 %v2323_v7 }
 0x235   :  { %2326 = vmatprep.subr.bf16.mxu0 %v2325_v8 }
 0x238   :  { %2328 = vmatpush1.bf16.msra.mxu0 %v2327_v49 }
 0x272   :  { %v1232_v15 = vpop.f32.mrb[2].mxu1 }
 0x273   :  { %v2365_v25 = vadd.f32 %v1232_v15, %v616_v13  ;;  %v1234_v16 = vpop.f32.mrb[3].mxu1 }
 0x274   :  { %v2366_v17 = vadd.f32 %v1234_v16, %v620_v14 }
 0x275   :  { %v1239_v19 = vmax.f32 %v2365_v25, 0.0 }
 0x276   :  { %v1240_v18 = vmax.f32 %v2366_v17, 0.0 }
 0x278   :  { %1516 = vmatprep.mubr.f32.mxu0 %v1240_v18 }
 0x279   :  { %1517 = vmatmul.mubr.f32.vlgmr.msra.gmra.mrb[2].mxu0 %v1239_v19 }
 0x34c   :  { %v1518_v29 = vpop.f32.mrb[2].mxu0 }
 0x34d   :  { %v2367_v30 = vadd.f32 %v1518_v29, %v1374_v27  ;;  %v1520_v41 = vpop.f32.mrb[3].mxu0 }
 0x34e   :  { %v2368_v31 = vadd.f32 %v1520_v41, %v1378_v28 }
 0x34f   :  { %v1523_v35 = vmax.f32 %v2367_v30, 0.0 }
 0x350   :  { %v1524_v32 = vmax.f32 %v2368_v31, 0.0 }
 0x352   :  { %1628 = vmatprep.mubr.f32.mxu1 %v1524_v32 }
 0x353   :  { %1629 = vmatmul.mubr.f32.vlgmr.msra.gmra.mrb[4].mxu1 %v1523_v35 }
 0x426   :  { %v1686_v48 = vpop.f32.mrb[4].mxu1 }
 0x427   :  { %v1687_v37 = vpop.f32.mrb[5].mxu1 }
 0x428   :  { %v1688_v39 = vadd.f32 %v1687_v37, %v1686_v48 }
 0x42a   :  { %v1631_v40 = vadd.f32 %v1688_v39, %v1653_v36 }
 0x42c   :  { %1635 = vst.msk [vmem:[#allocation11] sm:$0x3] %vm1634_vm0, %v1631_v40 }
 0x42d   :  { %2515 = shalt.err (!%p2512_p2)
}
 0x42e   :  { %s2516_s25 = scalar_lea.hbm %s2844_s7, 32 }
 0x42f   :  { %p2517_p3 = scmp.ne.s32.totalorder %s2844_s7, %s2516_s25  ;;  %p2520_p4 = scmp.lt.u32.totalorder %s2516_s25, %s2844_s7 }
 0x431   :  { %p2522_p5 = pnand %p2520_p4, %p2517_p3 }
 0x433   :  { %2525 = shalt.err (!%p2522_p5)
}
 0x434   :  { %1645 = dma.vmem_to_hbm [thread:$0]  %s1643_s23, 32, %s2844_s7, [#allocation4]  }
 0x435   :  { %2532 = dma.done.wait [#allocation4], 32  }
 0x436   :  { %2533 = vsyncadd [#allocation4], 4294967264 }
 0x437   :  { %1649 = vsyncpa [#allocation3], 1 }
 0x438   :  { %1650 = vsyncpa [#allocation6], 1 }
 0x439   :  { %1651 = vsyncpa [#allocation9], 1 }
 0x43a   :  { %1652 = vsyncpa [#allocation4], 1 }

</bundles_post_ra>
